<compile_context>
chip_gen: v6e
topology: v6e:2x2x1
jax: 0.10.0
libtpu: 0.0.40
codegen_flags: <defaults>
</compile_context>

<pallas_src>
import functools
import math

import jax
import jax.numpy as jnp
from jax.experimental import pallas as pl
from jax.experimental.pallas import tpu as pltpu


# ----------------------------------------------------------------------------
# Pallas kernel: one full bidirectional LSTM layer in a single invocation.
#   x_ref   : (T*B, F)      time-major flattened inputs
#   wih_ref : (F, 8H)       [W_ih_fwd^T | W_ih_bwd^T]
#   whh_ref : (2H, 8H)      block-diag: [[W_hh_fwd^T, 0], [0, W_hh_bwd^T]]
#   b_ref   : (1, 8H)       [b_fwd | b_bwd] with b = b_ih + b_hh
#   len_ref : (B, 1) int32  sequence lengths
#   o_ref   : (T*B, 2H)     [h_fwd | h_bwd] per (t, b) row
# ----------------------------------------------------------------------------
def _bilstm_layer_kernel(x_ref, wih_ref, whh_ref, b_ref, len_ref, o_ref,
                         *, seq_len, batch, hidden):
    T, B, H = seq_len, batch, hidden
    H4 = 4 * H

    # ---- Phase 1: input projection for the whole sequence, both directions,
    # as one well-shaped MXU matmul (hoisted off the serial recurrence path).
    gx = jnp.dot(x_ref[...], wih_ref[...],
                 preferred_element_type=jnp.float32) + b_ref[...]   # (T*B, 8H)

    # Loop-invariant loads (lengths read once, not per step).
    lens = len_ref[...]           # (B, 1) int32
    whh = whh_ref[...]            # (2H, 8H)

    h = jnp.zeros((B, 2 * H), jnp.float32)    # [h_fwd | h_bwd]
    c = jnp.zeros((B, 2 * H), jnp.float32)    # [c_fwd | c_bwd]

    # ---- Phase 2: serial recurrence, fwd and bwd fused in each step.
    # T is a small static shape here, so a static unroll gives fully static
    # indexing; for long sequences switch to lax.fori_loop + pl.ds.
    for s in range(T):
        tb = T - 1 - s            # time index processed by the bwd direction

        # One recurrent MXU push for both directions (block-diagonal W_hh).
        gh = jnp.dot(h, whh, preferred_element_type=jnp.float32)     # (B, 8H)

        g_f = gx[s * B:(s + 1) * B, 0:H4]          # fwd x-gates at time s
        g_b = gx[tb * B:(tb + 1) * B, H4:2 * H4]   # bwd x-gates at time tb
        gates = gh + jnp.concatenate([g_f, g_b], axis=-1)             # (B, 8H)

        # Full-slab activations (EUP work on whole 256-lane rows).
        sig = jax.nn.sigmoid(gates)
        th = jnp.tanh(gates)

        def cell(off, c_prev):
            i_g = sig[:, off + 0 * H:off + 1 * H]
            f_g = sig[:, off + 1 * H:off + 2 * H]
            g_g = th[:, off + 2 * H:off + 3 * H]
            o_g = sig[:, off + 3 * H:off + 4 * H]
            c_new = f_g * c_prev + i_g * g_g
            return c_new, o_g * jnp.tanh(c_new)

        c_f_new, h_f_new = cell(0, c[:, 0:H])
        c_b_new, h_b_new = cell(H4, c[:, H:2 * H])

        # Packed-sequence semantics: freeze state / zero output for t >= len.
        mask_f = lens > s          # (B, 1) bool
        mask_b = lens > tb

        c_next = jnp.concatenate(
            [jnp.where(mask_f, c_f_new, c[:, 0:H]),
             jnp.where(mask_b, c_b_new, c[:, H:2 * H])], axis=-1)
        h_next = jnp.concatenate(
            [jnp.where(mask_f, h_f_new, h[:, 0:H]),
             jnp.where(mask_b, h_b_new, h[:, H:2 * H])], axis=-1)
        c, h = c_next, h_next

        # Per-step writes land in the VMEM output block; the HBM writeback is
        # a single DMA of the whole (T*B, 2H) slab at kernel end.
        o_ref[s * B:(s + 1) * B, 0:H] = jnp.where(mask_f, h_f_new, 0.0)
        o_ref[tb * B:(tb + 1) * B, H:2 * H] = jnp.where(mask_b, h_b_new, 0.0)


def bilstm_layer(x, lengths_col, wih_cat, whh_blk, bias_cat, hidden):
    """One bidirectional LSTM layer: (T, B, F) -> (T, B, 2H)."""
    T, B, F = x.shape
    x2 = x.reshape(T * B, F)            # free XLA reshape; kernel stays 2-D
    const2 = lambda i: (0, 0)

    kernel = functools.partial(_bilstm_layer_kernel,
                               seq_len=T, batch=B, hidden=hidden)
    out = pl.pallas_call(
        kernel,
        out_shape=jax.ShapeDtypeStruct((T * B, 2 * hidden), jnp.float32),
        grid_spec=pltpu.PrefetchScalarGridSpec(
            num_scalar_prefetch=0,
            grid=(1,),                                   # single invocation
            in_specs=[
                pl.BlockSpec((T * B, F), const2),            # x (flattened)
                pl.BlockSpec((F, 8 * hidden), const2),       # W_ih (both dirs)
                pl.BlockSpec((2 * hidden, 8 * hidden), const2),  # W_hh blockdiag
                pl.BlockSpec((1, 8 * hidden), const2),       # bias
                pl.BlockSpec((B, 1), const2),                # lengths
            ],
            out_specs=pl.BlockSpec((T * B, 2 * hidden), const2),
        ),
        compiler_params=pltpu.CompilerParams(
            dimension_semantics=("arbitrary",)),
    )(x2, wih_cat, whh_blk, bias_cat, lengths_col)
    return out.reshape(T, B, 2 * hidden)


# ----------------------------------------------------------------------------
# Parameter init (deterministic, mirrors nn.Embedding / nn.LSTM shapes), with
# the per-layer fwd/bwd weights pre-fused into the kernel layout.
# ----------------------------------------------------------------------------
def init_params(key, vocab, embed_dim, hidden, num_layers):
    H = hidden
    keys = jax.random.split(key, 1 + num_layers * 8)
    params = {"embedding": jax.random.normal(
        keys[0], (vocab, embed_dim), jnp.float32)}
    k = 1.0 / math.sqrt(H)
    layers = []
    idx = 1
    for layer in range(num_layers):
        in_dim = embed_dim if layer == 0 else 2 * H
        per_dir = []
        for _direction in range(2):                       # fwd, bwd
            k1, k2, k3, k4 = keys[idx:idx + 4]
            idx += 4
            w_ih = jax.random.uniform(k1, (4 * H, in_dim), jnp.float32, -k, k)
            w_hh = jax.random.uniform(k2, (4 * H, H), jnp.float32, -k, k)
            b_ih = jax.random.uniform(k3, (4 * H,), jnp.float32, -k, k)
            b_hh = jax.random.uniform(k4, (4 * H,), jnp.float32, -k, k)
            per_dir.append((w_ih, w_hh, b_ih + b_hh))
        # Fused layouts: gate columns [i,f,g,o]_fwd | [i,f,g,o]_bwd
        wih_cat = jnp.concatenate([per_dir[0][0].T, per_dir[1][0].T], axis=1)
        whh_blk = jnp.zeros((2 * H, 8 * H), jnp.float32)
        whh_blk = whh_blk.at[0:H, 0:4 * H].set(per_dir[0][1].T)
        whh_blk = whh_blk.at[H:2 * H, 4 * H:8 * H].set(per_dir[1][1].T)
        bias_cat = jnp.concatenate([per_dir[0][2], per_dir[1][2]]).reshape(
            1, 8 * H)
        layers.append((wih_cat, whh_blk, bias_cat))
    params["lstm_layers"] = layers
    return params


# ----------------------------------------------------------------------------
# Full Bilstm.forward
# ----------------------------------------------------------------------------
def bilstm_forward(ids, lengths, start, end, params, hidden, num_layers):
    T, B = ids.shape
    assert max(lengths) == T, "pad_packed_sequence output len = max(lengths)"

    # Embedding lookup (max_norm=None config) + dropout in eval mode (identity).
    # TODO(synk): embedding gather kept as plain-JAX glue (data-dependent rows).
    emb_table = params["embedding"]
    x = jnp.take(emb_table, ids.reshape(-1), axis=0).reshape(T, B, -1)

    lengths_col = jnp.asarray(lengths, dtype=jnp.int32).reshape(B, 1)

    # Stacked bidirectional LSTM (one fused Pallas call per layer).
    h = x
    for (wih_cat, whh_blk, bias_cat) in params["lstm_layers"]:
        h = bilstm_layer(h, lengths_col, wih_cat, whh_blk, bias_cat, hidden)

    # h.transpose(0, 1) ; flatten ; append PAD zero row
    h_bt = jnp.transpose(h, (1, 0, 2))       # (B, T, 2H)
    z = 2 * hidden
    h_tem = h_bt.reshape(B * T, z)
    h_tem = jnp.concatenate([h_tem, jnp.zeros((1, z), h_tem.dtype)], axis=0)
    PAD = B * T

    # Index construction — identical to the PyTorch python loops (host side).
    sentence_length_max = max(lengths)
    target_length_max = max(e - s + 1 for s, e in zip(start, end))
    left_length_max = max(start)
    right_length_max = max(l - e - 1 for e, l in zip(end, lengths))
    sentence_not_target_length_max = max(
        lengths[i] - (e - s + 1) for i, (s, e) in enumerate(zip(start, end)))

    target_index, left_index, right_index, s_index = [], [], [], []
    for i in range(len(lengths)):
        l = [j + sentence_length_max * i for j in range(start[i], end[i] + 1)]
        l += [PAD] * (target_length_max - (end[i] - start[i] + 1))
        target_index += l
    for i in range(len(lengths)):
        l = [j + sentence_length_max * i for j in range(start[i])]
        l += [PAD] * (left_length_max - start[i])
        left_index += l
    for i in range(len(lengths)):
        l = [j + sentence_length_max * i for j in range(end[i] + 1, lengths[i])]
        l += [PAD] * (right_length_max - (lengths[i] - end[i] - 1))
        right_index += l
    for i, s_length in enumerate(lengths):
        l = [j + sentence_length_max * i for j in range(s_length)
             if not (start[i] <= j <= end[i])]
        l += [PAD] * (sentence_not_target_length_max - len(l))
        s_index += l

    # TODO(synk): index_select span gathers kept as plain-JAX glue.
    def gather(idx, width):
        idx_arr = jnp.asarray(idx, dtype=jnp.int32)
        return jnp.take(h_tem, idx_arr, axis=0).reshape(B, width, z)

    ht_part = gather(target_index, target_length_max)
    hi_part = gather(s_index, sentence_not_target_length_max)
    hl_part = gather(left_index, left_length_max) if len(left_index) else None
    hr_part = gather(right_index, right_length_max) if len(right_index) else None
    return hi_part, ht_part, hl_part, hr_part


if __name__ == "__main__":
    # config: embed_dim=32, hidden_dim=32, num_layers=2, dropout eval, max_norm=None
    T, B = 8, 2
    vocab, embed_dim, hidden, num_layers = 20, 32, 32, 2

    key = jax.random.PRNGKey(0)
    pkey, xkey = jax.random.split(key)
    params = init_params(pkey, vocab, embed_dim, hidden, num_layers)

    ids = jax.random.randint(xkey, (T, B), 0, vocab, dtype=jnp.int32)  # (seq, batch)
    lengths = [8, 6]   # sorted descending (pack_padded_sequence requirement)
    start = [2, 1]
    end = [4, 2]

    hi, ht, hl, hr = bilstm_forward(ids, lengths, start, end, params,
                                    hidden, num_layers)
    jax.block_until_ready((hi, ht, hl, hr))
    assert hi.shape == (B, max(lengths[i] - (end[i] - start[i] + 1)
                               for i in range(B)), 2 * hidden)
    assert ht.shape == (B, max(e - s + 1 for s, e in zip(start, end)), 2 * hidden)
    assert hl.shape == (B, max(start), 2 * hidden)
    assert hr.shape == (B, max(l - e - 1 for e, l in zip(end, lengths)), 2 * hidden)
    print("KERNEL_OK")
</pallas_src>

<mosaic_0001>
module attributes {stable_mosaic.version = 11 : i64} {
  func.func @_bilstm_layer_kernel(%arg0: i32, %arg1: memref<16x32xf32, #tpu.memory_space<vmem>>, %arg2: memref<32x256xf32, #tpu.memory_space<vmem>>, %arg3: memref<64x256xf32, #tpu.memory_space<vmem>>, %arg4: memref<1x256xf32, #tpu.memory_space<vmem>>, %arg5: memref<2x1xi32, #tpu.memory_space<vmem>>, %arg6: memref<16x64xf32, #tpu.memory_space<vmem>>) attributes {dimension_semantics = [#tpu.dimension_semantics<arbitrary>], iteration_bounds = array<i64: 1>, scalar_prefetch = 0 : i64, scratch_operands = 0 : i64, tpu.core_type = #tpu.core_type<tc>, window_params = [{pipeline_mode = #tpu.pipeline_mode<synchronous>, transform_indices = @transform_0, window_bounds = array<i64: 16, 32>}, {pipeline_mode = #tpu.pipeline_mode<synchronous>, transform_indices = @transform_1, window_bounds = array<i64: 32, 256>}, {pipeline_mode = #tpu.pipeline_mode<synchronous>, transform_indices = @transform_2, window_bounds = array<i64: 64, 256>}, {pipeline_mode = #tpu.pipeline_mode<synchronous>, transform_indices = @transform_3, window_bounds = array<i64: 1, 256>}, {pipeline_mode = #tpu.pipeline_mode<synchronous>, transform_indices = @transform_4, window_bounds = array<i64: 2, 1>}, {pipeline_mode = #tpu.pipeline_mode<synchronous>, transform_indices = @transform_5, window_bounds = array<i64: 16, 64>}]} {
    %c0 = arith.constant 0 : index
    %c0_0 = arith.constant 0 : index
    %0 = vector.load %arg1[%c0, %c0_0] : memref<16x32xf32, #tpu.memory_space<vmem>>, vector<16x32xf32>
    %c0_1 = arith.constant 0 : index
    %c0_2 = arith.constant 0 : index
    %1 = vector.load %arg2[%c0_1, %c0_2] : memref<32x256xf32, #tpu.memory_space<vmem>>, vector<32x256xf32>
    %cst = arith.constant dense<0.000000e+00> : vector<16x256xf32>
    %2 = tpu.matmul %0, %1, %cst {dimension_numbers = #tpu.dot_dimension_numbers<[1], [0], [0], [1], [0, 0, 1, 1], [], []>} : vector<16x32xf32>, vector<32x256xf32>, vector<16x256xf32> -> vector<16x256xf32>
    %c0_3 = arith.constant 0 : index
    %c0_4 = arith.constant 0 : index
    %3 = vector.load %arg4[%c0_3, %c0_4] : memref<1x256xf32, #tpu.memory_space<vmem>>, vector<1x256xf32>
    %4 = vector.broadcast %3 : vector<1x256xf32> to vector<16x256xf32>
    %5 = arith.addf %2, %4 : vector<16x256xf32>
    %c0_5 = arith.constant 0 : index
    %c0_6 = arith.constant 0 : index
    %6 = vector.load %arg5[%c0_5, %c0_6] : memref<2x1xi32, #tpu.memory_space<vmem>>, vector<2x1xi32>
    %c0_7 = arith.constant 0 : index
    %c0_8 = arith.constant 0 : index
    %7 = vector.load %arg3[%c0_7, %c0_8] : memref<64x256xf32, #tpu.memory_space<vmem>>, vector<64x256xf32>
    %cst_9 = arith.constant 0.000000e+00 : f32
    %8 = vector.broadcast %cst_9 : f32 to vector<2x64xf32>
    %cst_10 = arith.constant 0.000000e+00 : f32
    %9 = vector.broadcast %cst_10 : f32 to vector<2x64xf32>
    %cst_11 = arith.constant dense<0.000000e+00> : vector<2x256xf32>
    %10 = tpu.matmul %8, %7, %cst_11 {dimension_numbers = #tpu.dot_dimension_numbers<[1], [0], [0], [1], [0, 0, 1, 1], [], []>} : vector<2x64xf32>, vector<64x256xf32>, vector<2x256xf32> -> vector<2x256xf32>
    %11 = vector.extract_strided_slice %5 {offsets = [0, 0], sizes = [2, 128], strides = [1, 1]} : vector<16x256xf32> to vector<2x128xf32>
    %12 = vector.extract_strided_slice %5 {offsets = [14, 128], sizes = [2, 128], strides = [1, 1]} : vector<16x256xf32> to vector<2x128xf32>
    %13 = tpu.concatenate %11, %12 in 1 : vector<2x128xf32>, vector<2x128xf32> -> vector<2x256xf32>
    %14 = arith.addf %10, %13 : vector<2x256xf32>
    %15 = arith.negf %14 : vector<2x256xf32>
    %16 = math.exp %15 : vector<2x256xf32>
    %cst_12 = arith.constant 1.000000e+00 : f32
    %17 = vector.broadcast %cst_12 : f32 to vector<2x256xf32>
    %18 = arith.addf %17, %16 : vector<2x256xf32>
    %19 = arith.divf %17, %18 : vector<2x256xf32>
    %20 = math.tanh %14 : vector<2x256xf32>
    %21 = vector.extract_strided_slice %9 {offsets = [0, 0], sizes = [2, 32], strides = [1, 1]} : vector<2x64xf32> to vector<2x32xf32>
    %22 = vector.extract_strided_slice %19 {offsets = [0, 0], sizes = [2, 32], strides = [1, 1]} : vector<2x256xf32> to vector<2x32xf32>
    %23 = vector.extract_strided_slice %19 {offsets = [0, 32], sizes = [2, 32], strides = [1, 1]} : vector<2x256xf32> to vector<2x32xf32>
    %24 = vector.extract_strided_slice %20 {offsets = [0, 64], sizes = [2, 32], strides = [1, 1]} : vector<2x256xf32> to vector<2x32xf32>
    %25 = vector.extract_strided_slice %19 {offsets = [0, 96], sizes = [2, 32], strides = [1, 1]} : vector<2x256xf32> to vector<2x32xf32>
    %26 = arith.mulf %23, %21 : vector<2x32xf32>
    %27 = arith.mulf %22, %24 : vector<2x32xf32>
    %28 = arith.addf %26, %27 : vector<2x32xf32>
    %29 = math.tanh %28 : vector<2x32xf32>
    %30 = arith.mulf %25, %29 : vector<2x32xf32>
    %31 = vector.extract_strided_slice %9 {offsets = [0, 32], sizes = [2, 32], strides = [1, 1]} : vector<2x64xf32> to vector<2x32xf32>
    %32 = vector.extract_strided_slice %19 {offsets = [0, 128], sizes = [2, 32], strides = [1, 1]} : vector<2x256xf32> to vector<2x32xf32>
    %33 = vector.extract_strided_slice %19 {offsets = [0, 160], sizes = [2, 32], strides = [1, 1]} : vector<2x256xf32> to vector<2x32xf32>
    %34 = vector.extract_strided_slice %20 {offsets = [0, 192], sizes = [2, 32], strides = [1, 1]} : vector<2x256xf32> to vector<2x32xf32>
    %35 = vector.extract_strided_slice %19 {offsets = [0, 224], sizes = [2, 32], strides = [1, 1]} : vector<2x256xf32> to vector<2x32xf32>
    %36 = arith.mulf %33, %31 : vector<2x32xf32>
    %37 = arith.mulf %32, %34 : vector<2x32xf32>
    %38 = arith.addf %36, %37 : vector<2x32xf32>
    %39 = math.tanh %38 : vector<2x32xf32>
    %40 = arith.mulf %35, %39 : vector<2x32xf32>
    %c0_i32 = arith.constant 0 : i32
    %41 = vector.broadcast %c0_i32 : i32 to vector<2x1xi32>
    %42 = arith.cmpi sgt, %6, %41 : vector<2x1xi32>
    %c7_i32 = arith.constant 7 : i32
    %43 = vector.broadcast %c7_i32 : i32 to vector<2x1xi32>
    %44 = arith.cmpi sgt, %6, %43 : vector<2x1xi32>
    %45 = vector.extract_strided_slice %9 {offsets = [0, 0], sizes = [2, 32], strides = [1, 1]} : vector<2x64xf32> to vector<2x32xf32>
    %46 = vector.shape_cast %42 : vector<2x1xi1> to vector<2x1xi1>
    %47 = vector.broadcast %46 : vector<2x1xi1> to vector<2x32xi1>
    %48 = arith.select %47, %28, %45 : vector<2x32xi1>, vector<2x32xf32>
    %49 = vector.extract_strided_slice %9 {offsets = [0, 32], sizes = [2, 32], strides = [1, 1]} : vector<2x64xf32> to vector<2x32xf32>
    %50 = vector.shape_cast %44 : vector<2x1xi1> to vector<2x1xi1>
    %51 = vector.broadcast %50 : vector<2x1xi1> to vector<2x32xi1>
    %52 = arith.select %51, %38, %49 : vector<2x32xi1>, vector<2x32xf32>
    %53 = tpu.concatenate %48, %52 in 1 : vector<2x32xf32>, vector<2x32xf32> -> vector<2x64xf32>
    %54 = vector.extract_strided_slice %8 {offsets = [0, 0], sizes = [2, 32], strides = [1, 1]} : vector<2x64xf32> to vector<2x32xf32>
    %55 = vector.shape_cast %42 : vector<2x1xi1> to vector<2x1xi1>
    %56 = vector.broadcast %55 : vector<2x1xi1> to vector<2x32xi1>
    %57 = arith.select %56, %30, %54 : vector<2x32xi1>, vector<2x32xf32>
    %58 = vector.extract_strided_slice %8 {offsets = [0, 32], sizes = [2, 32], strides = [1, 1]} : vector<2x64xf32> to vector<2x32xf32>
    %59 = vector.shape_cast %44 : vector<2x1xi1> to vector<2x1xi1>
    %60 = vector.broadcast %59 : vector<2x1xi1> to vector<2x32xi1>
    %61 = arith.select %60, %40, %58 : vector<2x32xi1>, vector<2x32xf32>
    %62 = tpu.concatenate %57, %61 in 1 : vector<2x32xf32>, vector<2x32xf32> -> vector<2x64xf32>
    %cst_13 = arith.constant 0.000000e+00 : f32
    %63 = vector.shape_cast %42 : vector<2x1xi1> to vector<2x1xi1>
    %64 = vector.broadcast %63 : vector<2x1xi1> to vector<2x32xi1>
    %65 = vector.broadcast %cst_13 : f32 to vector<2x32xf32>
    %66 = arith.select %64, %30, %65 : vector<2x32xi1>, vector<2x32xf32>
    %c0_14 = arith.constant 0 : index
    %c0_15 = arith.constant 0 : index
    %67 = vector.load %arg6[%c0_14, %c0_15] : memref<16x64xf32, #tpu.memory_space<vmem>>, vector<2x32xf32>
    tpu.vector_store %arg6[%c0_14, %c0_15], %66 {strides = array<i32>} : memref<16x64xf32, #tpu.memory_space<vmem>>, vector<2x32xf32>,
    %cst_16 = arith.constant 0.000000e+00 : f32
    %68 = vector.shape_cast %44 : vector<2x1xi1> to vector<2x1xi1>
    %69 = vector.broadcast %68 : vector<2x1xi1> to vector<2x32xi1>
    %70 = vector.broadcast %cst_16 : f32 to vector<2x32xf32>
    %71 = arith.select %69, %40, %70 : vector<2x32xi1>, vector<2x32xf32>
    %c14 = arith.constant 14 : index
    %c32 = arith.constant 32 : index
    %72 = vector.load %arg6[%c14, %c32] : memref<16x64xf32, #tpu.memory_space<vmem>>, vector<2x32xf32>
    tpu.vector_store %arg6[%c14, %c32], %71 {strides = array<i32>} : memref<16x64xf32, #tpu.memory_space<vmem>>, vector<2x32xf32>,
    %cst_17 = arith.constant dense<0.000000e+00> : vector<2x256xf32>
    %73 = tpu.matmul %62, %7, %cst_17 {dimension_numbers = #tpu.dot_dimension_numbers<[1], [0], [0], [1], [0, 0, 1, 1], [], []>} : vector<2x64xf32>, vector<64x256xf32>, vector<2x256xf32> -> vector<2x256xf32>
    %74 = vector.extract_strided_slice %5 {offsets = [2, 0], sizes = [2, 128], strides = [1, 1]} : vector<16x256xf32> to vector<2x128xf32>
    %75 = vector.extract_strided_slice %5 {offsets = [12, 128], sizes = [2, 128], strides = [1, 1]} : vector<16x256xf32> to vector<2x128xf32>
    %76 = tpu.concatenate %74, %75 in 1 : vector<2x128xf32>, vector<2x128xf32> -> vector<2x256xf32>
    %77 = arith.addf %73, %76 : vector<2x256xf32>
    %78 = arith.negf %77 : vector<2x256xf32>
    %79 = math.exp %78 : vector<2x256xf32>
    %cst_18 = arith.constant 1.000000e+00 : f32
    %80 = vector.broadcast %cst_18 : f32 to vector<2x256xf32>
    %81 = arith.addf %80, %79 : vector<2x256xf32>
    %82 = arith.divf %80, %81 : vector<2x256xf32>
    %83 = math.tanh %77 : vector<2x256xf32>
    %84 = vector.extract_strided_slice %53 {offsets = [0, 0], sizes = [2, 32], strides = [1, 1]} : vector<2x64xf32> to vector<2x32xf32>
    %85 = vector.extract_strided_slice %82 {offsets = [0, 0], sizes = [2, 32], strides = [1, 1]} : vector<2x256xf32> to vector<2x32xf32>
    %86 = vector.extract_strided_slice %82 {offsets = [0, 32], sizes = [2, 32], strides = [1, 1]} : vector<2x256xf32> to vector<2x32xf32>
    %87 = vector.extract_strided_slice %83 {offsets = [0, 64], sizes = [2, 32], strides = [1, 1]} : vector<2x256xf32> to vector<2x32xf32>
    %88 = vector.extract_strided_slice %82 {offsets = [0, 96], sizes = [2, 32], strides = [1, 1]} : vector<2x256xf32> to vector<2x32xf32>
    %89 = arith.mulf %86, %84 : vector<2x32xf32>
    %90 = arith.mulf %85, %87 : vector<2x32xf32>
    %91 = arith.addf %89, %90 : vector<2x32xf32>
    %92 = math.tanh %91 : vector<2x32xf32>
    %93 = arith.mulf %88, %92 : vector<2x32xf32>
    %94 = vector.extract_strided_slice %53 {offsets = [0, 32], sizes = [2, 32], strides = [1, 1]} : vector<2x64xf32> to vector<2x32xf32>
    %95 = vector.extract_strided_slice %82 {offsets = [0, 128], sizes = [2, 32], strides = [1, 1]} : vector<2x256xf32> to vector<2x32xf32>
    %96 = vector.extract_strided_slice %82 {offsets = [0, 160], sizes = [2, 32], strides = [1, 1]} : vector<2x256xf32> to vector<2x32xf32>
    %97 = vector.extract_strided_slice %83 {offsets = [0, 192], sizes = [2, 32], strides = [1, 1]} : vector<2x256xf32> to vector<2x32xf32>
    %98 = vector.extract_strided_slice %82 {offsets = [0, 224], sizes = [2, 32], strides = [1, 1]} : vector<2x256xf32> to vector<2x32xf32>
    %99 = arith.mulf %96, %94 : vector<2x32xf32>
    %100 = arith.mulf %95, %97 : vector<2x32xf32>
    %101 = arith.addf %99, %100 : vector<2x32xf32>
    %102 = math.tanh %101 : vector<2x32xf32>
    %103 = arith.mulf %98, %102 : vector<2x32xf32>
    %c1_i32 = arith.constant 1 : i32
    %104 = vector.broadcast %c1_i32 : i32 to vector<2x1xi32>
    %105 = arith.cmpi sgt, %6, %104 : vector<2x1xi32>
    %c6_i32 = arith.constant 6 : i32
    %106 = vector.broadcast %c6_i32 : i32 to vector<2x1xi32>
    %107 = arith.cmpi sgt, %6, %106 : vector<2x1xi32>
    %108 = vector.extract_strided_slice %53 {offsets = [0, 0], sizes = [2, 32], strides = [1, 1]} : vector<2x64xf32> to vector<2x32xf32>
    %109 = vector.shape_cast %105 : vector<2x1xi1> to vector<2x1xi1>
    %110 = vector.broadcast %109 : vector<2x1xi1> to vector<2x32xi1>
    %111 = arith.select %110, %91, %108 : vector<2x32xi1>, vector<2x32xf32>
    %112 = vector.extract_strided_slice %53 {offsets = [0, 32], sizes = [2, 32], strides = [1, 1]} : vector<2x64xf32> to vector<2x32xf32>
    %113 = vector.shape_cast %107 : vector<2x1xi1> to vector<2x1xi1>
    %114 = vector.broadcast %113 : vector<2x1xi1> to vector<2x32xi1>
    %115 = arith.select %114, %101, %112 : vector<2x32xi1>, vector<2x32xf32>
    %116 = tpu.concatenate %111, %115 in 1 : vector<2x32xf32>, vector<2x32xf32> -> vector<2x64xf32>
    %117 = vector.extract_strided_slice %62 {offsets = [0, 0], sizes = [2, 32], strides = [1, 1]} : vector<2x64xf32> to vector<2x32xf32>
    %118 = vector.shape_cast %105 : vector<2x1xi1> to vector<2x1xi1>
    %119 = vector.broadcast %118 : vector<2x1xi1> to vector<2x32xi1>
    %120 = arith.select %119, %93, %117 : vector<2x32xi1>, vector<2x32xf32>
    %121 = vector.extract_strided_slice %62 {offsets = [0, 32], sizes = [2, 32], strides = [1, 1]} : vector<2x64xf32> to vector<2x32xf32>
    %122 = vector.shape_cast %107 : vector<2x1xi1> to vector<2x1xi1>
    %123 = vector.broadcast %122 : vector<2x1xi1> to vector<2x32xi1>
    %124 = arith.select %123, %103, %121 : vector<2x32xi1>, vector<2x32xf32>
    %125 = tpu.concatenate %120, %124 in 1 : vector<2x32xf32>, vector<2x32xf32> -> vector<2x64xf32>
    %cst_19 = arith.constant 0.000000e+00 : f32
    %126 = vector.shape_cast %105 : vector<2x1xi1> to vector<2x1xi1>
    %127 = vector.broadcast %126 : vector<2x1xi1> to vector<2x32xi1>
    %128 = vector.broadcast %cst_19 : f32 to vector<2x32xf32>
    %129 = arith.select %127, %93, %128 : vector<2x32xi1>, vector<2x32xf32>
    %c2 = arith.constant 2 : index
    %c0_20 = arith.constant 0 : index
    %130 = vector.load %arg6[%c2, %c0_20] : memref<16x64xf32, #tpu.memory_space<vmem>>, vector<2x32xf32>
    tpu.vector_store %arg6[%c2, %c0_20], %129 {strides = array<i32>} : memref<16x64xf32, #tpu.memory_space<vmem>>, vector<2x32xf32>,
    %cst_21 = arith.constant 0.000000e+00 : f32
    %131 = vector.shape_cast %107 : vector<2x1xi1> to vector<2x1xi1>
    %132 = vector.broadcast %131 : vector<2x1xi1> to vector<2x32xi1>
    %133 = vector.broadcast %cst_21 : f32 to vector<2x32xf32>
    %134 = arith.select %132, %103, %133 : vector<2x32xi1>, vector<2x32xf32>
    %c12 = arith.constant 12 : index
    %c32_22 = arith.constant 32 : index
    %135 = vector.load %arg6[%c12, %c32_22] : memref<16x64xf32, #tpu.memory_space<vmem>>, vector<2x32xf32>
    tpu.vector_store %arg6[%c12, %c32_22], %134 {strides = array<i32>} : memref<16x64xf32, #tpu.memory_space<vmem>>, vector<2x32xf32>,
    %cst_23 = arith.constant dense<0.000000e+00> : vector<2x256xf32>
    %136 = tpu.matmul %125, %7, %cst_23 {dimension_numbers = #tpu.dot_dimension_numbers<[1], [0], [0], [1], [0, 0, 1, 1], [], []>} : vector<2x64xf32>, vector<64x256xf32>, vector<2x256xf32> -> vector<2x256xf32>
    %137 = vector.extract_strided_slice %5 {offsets = [4, 0], sizes = [2, 128], strides = [1, 1]} : vector<16x256xf32> to vector<2x128xf32>
    %138 = vector.extract_strided_slice %5 {offsets = [10, 128], sizes = [2, 128], strides = [1, 1]} : vector<16x256xf32> to vector<2x128xf32>
    %139 = tpu.concatenate %137, %138 in 1 : vector<2x128xf32>, vector<2x128xf32> -> vector<2x256xf32>
    %140 = arith.addf %136, %139 : vector<2x256xf32>
    %141 = arith.negf %140 : vector<2x256xf32>
    %142 = math.exp %141 : vector<2x256xf32>
    %cst_24 = arith.constant 1.000000e+00 : f32
    %143 = vector.broadcast %cst_24 : f32 to vector<2x256xf32>
    %144 = arith.addf %143, %142 : vector<2x256xf32>
    %145 = arith.divf %143, %144 : vector<2x256xf32>
    %146 = math.tanh %140 : vector<2x256xf32>
    %147 = vector.extract_strided_slice %116 {offsets = [0, 0], sizes = [2, 32], strides = [1, 1]} : vector<2x64xf32> to vector<2x32xf32>
    %148 = vector.extract_strided_slice %145 {offsets = [0, 0], sizes = [2, 32], strides = [1, 1]} : vector<2x256xf32> to vector<2x32xf32>
    %149 = vector.extract_strided_slice %145 {offsets = [0, 32], sizes = [2, 32], strides = [1, 1]} : vector<2x256xf32> to vector<2x32xf32>
    %150 = vector.extract_strided_slice %146 {offsets = [0, 64], sizes = [2, 32], strides = [1, 1]} : vector<2x256xf32> to vector<2x32xf32>
    %151 = vector.extract_strided_slice %145 {offsets = [0, 96], sizes = [2, 32], strides = [1, 1]} : vector<2x256xf32> to vector<2x32xf32>
    %152 = arith.mulf %149, %147 : vector<2x32xf32>
    %153 = arith.mulf %148, %150 : vector<2x32xf32>
    %154 = arith.addf %152, %153 : vector<2x32xf32>
    %155 = math.tanh %154 : vector<2x32xf32>
    %156 = arith.mulf %151, %155 : vector<2x32xf32>
    %157 = vector.extract_strided_slice %116 {offsets = [0, 32], sizes = [2, 32], strides = [1, 1]} : vector<2x64xf32> to vector<2x32xf32>
    %158 = vector.extract_strided_slice %145 {offsets = [0, 128], sizes = [2, 32], strides = [1, 1]} : vector<2x256xf32> to vector<2x32xf32>
    %159 = vector.extract_strided_slice %145 {offsets = [0, 160], sizes = [2, 32], strides = [1, 1]} : vector<2x256xf32> to vector<2x32xf32>
    %160 = vector.extract_strided_slice %146 {offsets = [0, 192], sizes = [2, 32], strides = [1, 1]} : vector<2x256xf32> to vector<2x32xf32>
    %161 = vector.extract_strided_slice %145 {offsets = [0, 224], sizes = [2, 32], strides = [1, 1]} : vector<2x256xf32> to vector<2x32xf32>
    %162 = arith.mulf %159, %157 : vector<2x32xf32>
    %163 = arith.mulf %158, %160 : vector<2x32xf32>
    %164 = arith.addf %162, %163 : vector<2x32xf32>
    %165 = math.tanh %164 : vector<2x32xf32>
    %166 = arith.mulf %161, %165 : vector<2x32xf32>
    %c2_i32 = arith.constant 2 : i32
    %167 = vector.broadcast %c2_i32 : i32 to vector<2x1xi32>
    %168 = arith.cmpi sgt, %6, %167 : vector<2x1xi32>
    %c5_i32 = arith.constant 5 : i32
    %169 = vector.broadcast %c5_i32 : i32 to vector<2x1xi32>
    %170 = arith.cmpi sgt, %6, %169 : vector<2x1xi32>
    %171 = vector.extract_strided_slice %116 {offsets = [0, 0], sizes = [2, 32], strides = [1, 1]} : vector<2x64xf32> to vector<2x32xf32>
    %172 = vector.shape_cast %168 : vector<2x1xi1> to vector<2x1xi1>
    %173 = vector.broadcast %172 : vector<2x1xi1> to vector<2x32xi1>
    %174 = arith.select %173, %154, %171 : vector<2x32xi1>, vector<2x32xf32>
    %175 = vector.extract_strided_slice %116 {offsets = [0, 32], sizes = [2, 32], strides = [1, 1]} : vector<2x64xf32> to vector<2x32xf32>
    %176 = vector.shape_cast %170 : vector<2x1xi1> to vector<2x1xi1>
    %177 = vector.broadcast %176 : vector<2x1xi1> to vector<2x32xi1>
    %178 = arith.select %177, %164, %175 : vector<2x32xi1>, vector<2x32xf32>
    %179 = tpu.concatenate %174, %178 in 1 : vector<2x32xf32>, vector<2x32xf32> -> vector<2x64xf32>
    %180 = vector.extract_strided_slice %125 {offsets = [0, 0], sizes = [2, 32], strides = [1, 1]} : vector<2x64xf32> to vector<2x32xf32>
    %181 = vector.shape_cast %168 : vector<2x1xi1> to vector<2x1xi1>
    %182 = vector.broadcast %181 : vector<2x1xi1> to vector<2x32xi1>
    %183 = arith.select %182, %156, %180 : vector<2x32xi1>, vector<2x32xf32>
    %184 = vector.extract_strided_slice %125 {offsets = [0, 32], sizes = [2, 32], strides = [1, 1]} : vector<2x64xf32> to vector<2x32xf32>
    %185 = vector.shape_cast %170 : vector<2x1xi1> to vector<2x1xi1>
    %186 = vector.broadcast %185 : vector<2x1xi1> to vector<2x32xi1>
    %187 = arith.select %186, %166, %184 : vector<2x32xi1>, vector<2x32xf32>
    %188 = tpu.concatenate %183, %187 in 1 : vector<2x32xf32>, vector<2x32xf32> -> vector<2x64xf32>
    %cst_25 = arith.constant 0.000000e+00 : f32
    %189 = vector.shape_cast %168 : vector<2x1xi1> to vector<2x1xi1>
    %190 = vector.broadcast %189 : vector<2x1xi1> to vector<2x32xi1>
    %191 = vector.broadcast %cst_25 : f32 to vector<2x32xf32>
    %192 = arith.select %190, %156, %191 : vector<2x32xi1>, vector<2x32xf32>
    %c4 = arith.constant 4 : index
    %c0_26 = arith.constant 0 : index
    %193 = vector.load %arg6[%c4, %c0_26] : memref<16x64xf32, #tpu.memory_space<vmem>>, vector<2x32xf32>
    tpu.vector_store %arg6[%c4, %c0_26], %192 {strides = array<i32>} : memref<16x64xf32, #tpu.memory_space<vmem>>, vector<2x32xf32>,
    %cst_27 = arith.constant 0.000000e+00 : f32
    %194 = vector.shape_cast %170 : vector<2x1xi1> to vector<2x1xi1>
    %195 = vector.broadcast %194 : vector<2x1xi1> to vector<2x32xi1>
    %196 = vector.broadcast %cst_27 : f32 to vector<2x32xf32>
    %197 = arith.select %195, %166, %196 : vector<2x32xi1>, vector<2x32xf32>
    %c10 = arith.constant 10 : index
    %c32_28 = arith.constant 32 : index
    %198 = vector.load %arg6[%c10, %c32_28] : memref<16x64xf32, #tpu.memory_space<vmem>>, vector<2x32xf32>
    tpu.vector_store %arg6[%c10, %c32_28], %197 {strides = array<i32>} : memref<16x64xf32, #tpu.memory_space<vmem>>, vector<2x32xf32>,
    %cst_29 = arith.constant dense<0.000000e+00> : vector<2x256xf32>
    %199 = tpu.matmul %188, %7, %cst_29 {dimension_numbers = #tpu.dot_dimension_numbers<[1], [0], [0], [1], [0, 0, 1, 1], [], []>} : vector<2x64xf32>, vector<64x256xf32>, vector<2x256xf32> -> vector<2x256xf32>
    %200 = vector.extract_strided_slice %5 {offsets = [6, 0], sizes = [2, 128], strides = [1, 1]} : vector<16x256xf32> to vector<2x128xf32>
    %201 = vector.extract_strided_slice %5 {offsets = [8, 128], sizes = [2, 128], strides = [1, 1]} : vector<16x256xf32> to vector<2x128xf32>
    %202 = tpu.concatenate %200, %201 in 1 : vector<2x128xf32>, vector<2x128xf32> -> vector<2x256xf32>
    %203 = arith.addf %199, %202 : vector<2x256xf32>
    %204 = arith.negf %203 : vector<2x256xf32>
    %205 = math.exp %204 : vector<2x256xf32>
    %cst_30 = arith.constant 1.000000e+00 : f32
    %206 = vector.broadcast %cst_30 : f32 to vector<2x256xf32>
    %207 = arith.addf %206, %205 : vector<2x256xf32>
    %208 = arith.divf %206, %207 : vector<2x256xf32>
    %209 = math.tanh %203 : vector<2x256xf32>
    %210 = vector.extract_strided_slice %179 {offsets = [0, 0], sizes = [2, 32], strides = [1, 1]} : vector<2x64xf32> to vector<2x32xf32>
    %211 = vector.extract_strided_slice %208 {offsets = [0, 0], sizes = [2, 32], strides = [1, 1]} : vector<2x256xf32> to vector<2x32xf32>
    %212 = vector.extract_strided_slice %208 {offsets = [0, 32], sizes = [2, 32], strides = [1, 1]} : vector<2x256xf32> to vector<2x32xf32>
    %213 = vector.extract_strided_slice %209 {offsets = [0, 64], sizes = [2, 32], strides = [1, 1]} : vector<2x256xf32> to vector<2x32xf32>
    %214 = vector.extract_strided_slice %208 {offsets = [0, 96], sizes = [2, 32], strides = [1, 1]} : vector<2x256xf32> to vector<2x32xf32>
    %215 = arith.mulf %212, %210 : vector<2x32xf32>
    %216 = arith.mulf %211, %213 : vector<2x32xf32>
    %217 = arith.addf %215, %216 : vector<2x32xf32>
    %218 = math.tanh %217 : vector<2x32xf32>
    %219 = arith.mulf %214, %218 : vector<2x32xf32>
    %220 = vector.extract_strided_slice %179 {offsets = [0, 32], sizes = [2, 32], strides = [1, 1]} : vector<2x64xf32> to vector<2x32xf32>
    %221 = vector.extract_strided_slice %208 {offsets = [0, 128], sizes = [2, 32], strides = [1, 1]} : vector<2x256xf32> to vector<2x32xf32>
    %222 = vector.extract_strided_slice %208 {offsets = [0, 160], sizes = [2, 32], strides = [1, 1]} : vector<2x256xf32> to vector<2x32xf32>
    %223 = vector.extract_strided_slice %209 {offsets = [0, 192], sizes = [2, 32], strides = [1, 1]} : vector<2x256xf32> to vector<2x32xf32>
    %224 = vector.extract_strided_slice %208 {offsets = [0, 224], sizes = [2, 32], strides = [1, 1]} : vector<2x256xf32> to vector<2x32xf32>
    %225 = arith.mulf %222, %220 : vector<2x32xf32>
    %226 = arith.mulf %221, %223 : vector<2x32xf32>
    %227 = arith.addf %225, %226 : vector<2x32xf32>
    %228 = math.tanh %227 : vector<2x32xf32>
    %229 = arith.mulf %224, %228 : vector<2x32xf32>
    %c3_i32 = arith.constant 3 : i32
    %230 = vector.broadcast %c3_i32 : i32 to vector<2x1xi32>
    %231 = arith.cmpi sgt, %6, %230 : vector<2x1xi32>
    %c4_i32 = arith.constant 4 : i32
    %232 = vector.broadcast %c4_i32 : i32 to vector<2x1xi32>
    %233 = arith.cmpi sgt, %6, %232 : vector<2x1xi32>
    %234 = vector.extract_strided_slice %179 {offsets = [0, 0], sizes = [2, 32], strides = [1, 1]} : vector<2x64xf32> to vector<2x32xf32>
    %235 = vector.shape_cast %231 : vector<2x1xi1> to vector<2x1xi1>
    %236 = vector.broadcast %235 : vector<2x1xi1> to vector<2x32xi1>
    %237 = arith.select %236, %217, %234 : vector<2x32xi1>, vector<2x32xf32>
    %238 = vector.extract_strided_slice %179 {offsets = [0, 32], sizes = [2, 32], strides = [1, 1]} : vector<2x64xf32> to vector<2x32xf32>
    %239 = vector.shape_cast %233 : vector<2x1xi1> to vector<2x1xi1>
    %240 = vector.broadcast %239 : vector<2x1xi1> to vector<2x32xi1>
    %241 = arith.select %240, %227, %238 : vector<2x32xi1>, vector<2x32xf32>
    %242 = tpu.concatenate %237, %241 in 1 : vector<2x32xf32>, vector<2x32xf32> -> vector<2x64xf32>
    %243 = vector.extract_strided_slice %188 {offsets = [0, 0], sizes = [2, 32], strides = [1, 1]} : vector<2x64xf32> to vector<2x32xf32>
    %244 = vector.shape_cast %231 : vector<2x1xi1> to vector<2x1xi1>
    %245 = vector.broadcast %244 : vector<2x1xi1> to vector<2x32xi1>
    %246 = arith.select %245, %219, %243 : vector<2x32xi1>, vector<2x32xf32>
    %247 = vector.extract_strided_slice %188 {offsets = [0, 32], sizes = [2, 32], strides = [1, 1]} : vector<2x64xf32> to vector<2x32xf32>
    %248 = vector.shape_cast %233 : vector<2x1xi1> to vector<2x1xi1>
    %249 = vector.broadcast %248 : vector<2x1xi1> to vector<2x32xi1>
    %250 = arith.select %249, %229, %247 : vector<2x32xi1>, vector<2x32xf32>
    %251 = tpu.concatenate %246, %250 in 1 : vector<2x32xf32>, vector<2x32xf32> -> vector<2x64xf32>
    %cst_31 = arith.constant 0.000000e+00 : f32
    %252 = vector.shape_cast %231 : vector<2x1xi1> to vector<2x1xi1>
    %253 = vector.broadcast %252 : vector<2x1xi1> to vector<2x32xi1>
    %254 = vector.broadcast %cst_31 : f32 to vector<2x32xf32>
    %255 = arith.select %253, %219, %254 : vector<2x32xi1>, vector<2x32xf32>
    %c6 = arith.constant 6 : index
    %c0_32 = arith.constant 0 : index
    %256 = vector.load %arg6[%c6, %c0_32] : memref<16x64xf32, #tpu.memory_space<vmem>>, vector<2x32xf32>
    tpu.vector_store %arg6[%c6, %c0_32], %255 {strides = array<i32>} : memref<16x64xf32, #tpu.memory_space<vmem>>, vector<2x32xf32>,
    %cst_33 = arith.constant 0.000000e+00 : f32
    %257 = vector.shape_cast %233 : vector<2x1xi1> to vector<2x1xi1>
    %258 = vector.broadcast %257 : vector<2x1xi1> to vector<2x32xi1>
    %259 = vector.broadcast %cst_33 : f32 to vector<2x32xf32>
    %260 = arith.select %258, %229, %259 : vector<2x32xi1>, vector<2x32xf32>
    %c8 = arith.constant 8 : index
    %c32_34 = arith.constant 32 : index
    %261 = vector.load %arg6[%c8, %c32_34] : memref<16x64xf32, #tpu.memory_space<vmem>>, vector<2x32xf32>
    tpu.vector_store %arg6[%c8, %c32_34], %260 {strides = array<i32>} : memref<16x64xf32, #tpu.memory_space<vmem>>, vector<2x32xf32>,
    %cst_35 = arith.constant dense<0.000000e+00> : vector<2x256xf32>
    %262 = tpu.matmul %251, %7, %cst_35 {dimension_numbers = #tpu.dot_dimension_numbers<[1], [0], [0], [1], [0, 0, 1, 1], [], []>} : vector<2x64xf32>, vector<64x256xf32>, vector<2x256xf32> -> vector<2x256xf32>
    %263 = vector.extract_strided_slice %5 {offsets = [8, 0], sizes = [2, 128], strides = [1, 1]} : vector<16x256xf32> to vector<2x128xf32>
    %264 = vector.extract_strided_slice %5 {offsets = [6, 128], sizes = [2, 128], strides = [1, 1]} : vector<16x256xf32> to vector<2x128xf32>
    %265 = tpu.concatenate %263, %264 in 1 : vector<2x128xf32>, vector<2x128xf32> -> vector<2x256xf32>
    %266 = arith.addf %262, %265 : vector<2x256xf32>
    %267 = arith.negf %266 : vector<2x256xf32>
    %268 = math.exp %267 : vector<2x256xf32>
    %cst_36 = arith.constant 1.000000e+00 : f32
    %269 = vector.broadcast %cst_36 : f32 to vector<2x256xf32>
    %270 = arith.addf %269, %268 : vector<2x256xf32>
    %271 = arith.divf %269, %270 : vector<2x256xf32>
    %272 = math.tanh %266 : vector<2x256xf32>
    %273 = vector.extract_strided_slice %242 {offsets = [0, 0], sizes = [2, 32], strides = [1, 1]} : vector<2x64xf32> to vector<2x32xf32>
    %274 = vector.extract_strided_slice %271 {offsets = [0, 0], sizes = [2, 32], strides = [1, 1]} : vector<2x256xf32> to vector<2x32xf32>
    %275 = vector.extract_strided_slice %271 {offsets = [0, 32], sizes = [2, 32], strides = [1, 1]} : vector<2x256xf32> to vector<2x32xf32>
    %276 = vector.extract_strided_slice %272 {offsets = [0, 64], sizes = [2, 32], strides = [1, 1]} : vector<2x256xf32> to vector<2x32xf32>
    %277 = vector.extract_strided_slice %271 {offsets = [0, 96], sizes = [2, 32], strides = [1, 1]} : vector<2x256xf32> to vector<2x32xf32>
    %278 = arith.mulf %275, %273 : vector<2x32xf32>
    %279 = arith.mulf %274, %276 : vector<2x32xf32>
    %280 = arith.addf %278, %279 : vector<2x32xf32>
    %281 = math.tanh %280 : vector<2x32xf32>
    %282 = arith.mulf %277, %281 : vector<2x32xf32>
    %283 = vector.extract_strided_slice %242 {offsets = [0, 32], sizes = [2, 32], strides = [1, 1]} : vector<2x64xf32> to vector<2x32xf32>
    %284 = vector.extract_strided_slice %271 {offsets = [0, 128], sizes = [2, 32], strides = [1, 1]} : vector<2x256xf32> to vector<2x32xf32>
    %285 = vector.extract_strided_slice %271 {offsets = [0, 160], sizes = [2, 32], strides = [1, 1]} : vector<2x256xf32> to vector<2x32xf32>
    %286 = vector.extract_strided_slice %272 {offsets = [0, 192], sizes = [2, 32], strides = [1, 1]} : vector<2x256xf32> to vector<2x32xf32>
    %287 = vector.extract_strided_slice %271 {offsets = [0, 224], sizes = [2, 32], strides = [1, 1]} : vector<2x256xf32> to vector<2x32xf32>
    %288 = arith.mulf %285, %283 : vector<2x32xf32>
    %289 = arith.mulf %284, %286 : vector<2x32xf32>
    %290 = arith.addf %288, %289 : vector<2x32xf32>
    %291 = math.tanh %290 : vector<2x32xf32>
    %292 = arith.mulf %287, %291 : vector<2x32xf32>
    %c4_i32_37 = arith.constant 4 : i32
    %293 = vector.broadcast %c4_i32_37 : i32 to vector<2x1xi32>
    %294 = arith.cmpi sgt, %6, %293 : vector<2x1xi32>
    %c3_i32_38 = arith.constant 3 : i32
    %295 = vector.broadcast %c3_i32_38 : i32 to vector<2x1xi32>
    %296 = arith.cmpi sgt, %6, %295 : vector<2x1xi32>
    %297 = vector.extract_strided_slice %242 {offsets = [0, 0], sizes = [2, 32], strides = [1, 1]} : vector<2x64xf32> to vector<2x32xf32>
    %298 = vector.shape_cast %294 : vector<2x1xi1> to vector<2x1xi1>
    %299 = vector.broadcast %298 : vector<2x1xi1> to vector<2x32xi1>
    %300 = arith.select %299, %280, %297 : vector<2x32xi1>, vector<2x32xf32>
    %301 = vector.extract_strided_slice %242 {offsets = [0, 32], sizes = [2, 32], strides = [1, 1]} : vector<2x64xf32> to vector<2x32xf32>
    %302 = vector.shape_cast %296 : vector<2x1xi1> to vector<2x1xi1>
    %303 = vector.broadcast %302 : vector<2x1xi1> to vector<2x32xi1>
    %304 = arith.select %303, %290, %301 : vector<2x32xi1>, vector<2x32xf32>
    %305 = tpu.concatenate %300, %304 in 1 : vector<2x32xf32>, vector<2x32xf32> -> vector<2x64xf32>
    %306 = vector.extract_strided_slice %251 {offsets = [0, 0], sizes = [2, 32], strides = [1, 1]} : vector<2x64xf32> to vector<2x32xf32>
    %307 = vector.shape_cast %294 : vector<2x1xi1> to vector<2x1xi1>
    %308 = vector.broadcast %307 : vector<2x1xi1> to vector<2x32xi1>
    %309 = arith.select %308, %282, %306 : vector<2x32xi1>, vector<2x32xf32>
    %310 = vector.extract_strided_slice %251 {offsets = [0, 32], sizes = [2, 32], strides = [1, 1]} : vector<2x64xf32> to vector<2x32xf32>
    %311 = vector.shape_cast %296 : vector<2x1xi1> to vector<2x1xi1>
    %312 = vector.broadcast %311 : vector<2x1xi1> to vector<2x32xi1>
    %313 = arith.select %312, %292, %310 : vector<2x32xi1>, vector<2x32xf32>
    %314 = tpu.concatenate %309, %313 in 1 : vector<2x32xf32>, vector<2x32xf32> -> vector<2x64xf32>
    %cst_39 = arith.constant 0.000000e+00 : f32
    %315 = vector.shape_cast %294 : vector<2x1xi1> to vector<2x1xi1>
    %316 = vector.broadcast %315 : vector<2x1xi1> to vector<2x32xi1>
    %317 = vector.broadcast %cst_39 : f32 to vector<2x32xf32>
    %318 = arith.select %316, %282, %317 : vector<2x32xi1>, vector<2x32xf32>
    %c8_40 = arith.constant 8 : index
    %c0_41 = arith.constant 0 : index
    %319 = vector.load %arg6[%c8_40, %c0_41] : memref<16x64xf32, #tpu.memory_space<vmem>>, vector<2x32xf32>
    tpu.vector_store %arg6[%c8_40, %c0_41], %318 {strides = array<i32>} : memref<16x64xf32, #tpu.memory_space<vmem>>, vector<2x32xf32>,
    %cst_42 = arith.constant 0.000000e+00 : f32
    %320 = vector.shape_cast %296 : vector<2x1xi1> to vector<2x1xi1>
    %321 = vector.broadcast %320 : vector<2x1xi1> to vector<2x32xi1>
    %322 = vector.broadcast %cst_42 : f32 to vector<2x32xf32>
    %323 = arith.select %321, %292, %322 : vector<2x32xi1>, vector<2x32xf32>
    %c6_43 = arith.constant 6 : index
    %c32_44 = arith.constant 32 : index
    %324 = vector.load %arg6[%c6_43, %c32_44] : memref<16x64xf32, #tpu.memory_space<vmem>>, vector<2x32xf32>
    tpu.vector_store %arg6[%c6_43, %c32_44], %323 {strides = array<i32>} : memref<16x64xf32, #tpu.memory_space<vmem>>, vector<2x32xf32>,
    %cst_45 = arith.constant dense<0.000000e+00> : vector<2x256xf32>
    %325 = tpu.matmul %314, %7, %cst_45 {dimension_numbers = #tpu.dot_dimension_numbers<[1], [0], [0], [1], [0, 0, 1, 1], [], []>} : vector<2x64xf32>, vector<64x256xf32>, vector<2x256xf32> -> vector<2x256xf32>
    %326 = vector.extract_strided_slice %5 {offsets = [10, 0], sizes = [2, 128], strides = [1, 1]} : vector<16x256xf32> to vector<2x128xf32>
    %327 = vector.extract_strided_slice %5 {offsets = [4, 128], sizes = [2, 128], strides = [1, 1]} : vector<16x256xf32> to vector<2x128xf32>
    %328 = tpu.concatenate %326, %327 in 1 : vector<2x128xf32>, vector<2x128xf32> -> vector<2x256xf32>
    %329 = arith.addf %325, %328 : vector<2x256xf32>
    %330 = arith.negf %329 : vector<2x256xf32>
    %331 = math.exp %330 : vector<2x256xf32>
    %cst_46 = arith.constant 1.000000e+00 : f32
    %332 = vector.broadcast %cst_46 : f32 to vector<2x256xf32>
    %333 = arith.addf %332, %331 : vector<2x256xf32>
    %334 = arith.divf %332, %333 : vector<2x256xf32>
    %335 = math.tanh %329 : vector<2x256xf32>
    %336 = vector.extract_strided_slice %305 {offsets = [0, 0], sizes = [2, 32], strides = [1, 1]} : vector<2x64xf32> to vector<2x32xf32>
    %337 = vector.extract_strided_slice %334 {offsets = [0, 0], sizes = [2, 32], strides = [1, 1]} : vector<2x256xf32> to vector<2x32xf32>
    %338 = vector.extract_strided_slice %334 {offsets = [0, 32], sizes = [2, 32], strides = [1, 1]} : vector<2x256xf32> to vector<2x32xf32>
    %339 = vector.extract_strided_slice %335 {offsets = [0, 64], sizes = [2, 32], strides = [1, 1]} : vector<2x256xf32> to vector<2x32xf32>
    %340 = vector.extract_strided_slice %334 {offsets = [0, 96], sizes = [2, 32], strides = [1, 1]} : vector<2x256xf32> to vector<2x32xf32>
    %341 = arith.mulf %338, %336 : vector<2x32xf32>
    %342 = arith.mulf %337, %339 : vector<2x32xf32>
    %343 = arith.addf %341, %342 : vector<2x32xf32>
    %344 = math.tanh %343 : vector<2x32xf32>
    %345 = arith.mulf %340, %344 : vector<2x32xf32>
    %346 = vector.extract_strided_slice %305 {offsets = [0, 32], sizes = [2, 32], strides = [1, 1]} : vector<2x64xf32> to vector<2x32xf32>
    %347 = vector.extract_strided_slice %334 {offsets = [0, 128], sizes = [2, 32], strides = [1, 1]} : vector<2x256xf32> to vector<2x32xf32>
    %348 = vector.extract_strided_slice %334 {offsets = [0, 160], sizes = [2, 32], strides = [1, 1]} : vector<2x256xf32> to vector<2x32xf32>
    %349 = vector.extract_strided_slice %335 {offsets = [0, 192], sizes = [2, 32], strides = [1, 1]} : vector<2x256xf32> to vector<2x32xf32>
    %350 = vector.extract_strided_slice %334 {offsets = [0, 224], sizes = [2, 32], strides = [1, 1]} : vector<2x256xf32> to vector<2x32xf32>
    %351 = arith.mulf %348, %346 : vector<2x32xf32>
    %352 = arith.mulf %347, %349 : vector<2x32xf32>
    %353 = arith.addf %351, %352 : vector<2x32xf32>
    %354 = math.tanh %353 : vector<2x32xf32>
    %355 = arith.mulf %350, %354 : vector<2x32xf32>
    %c5_i32_47 = arith.constant 5 : i32
    %356 = vector.broadcast %c5_i32_47 : i32 to vector<2x1xi32>
    %357 = arith.cmpi sgt, %6, %356 : vector<2x1xi32>
    %c2_i32_48 = arith.constant 2 : i32
    %358 = vector.broadcast %c2_i32_48 : i32 to vector<2x1xi32>
    %359 = arith.cmpi sgt, %6, %358 : vector<2x1xi32>
    %360 = vector.extract_strided_slice %305 {offsets = [0, 0], sizes = [2, 32], strides = [1, 1]} : vector<2x64xf32> to vector<2x32xf32>
    %361 = vector.shape_cast %357 : vector<2x1xi1> to vector<2x1xi1>
    %362 = vector.broadcast %361 : vector<2x1xi1> to vector<2x32xi1>
    %363 = arith.select %362, %343, %360 : vector<2x32xi1>, vector<2x32xf32>
    %364 = vector.extract_strided_slice %305 {offsets = [0, 32], sizes = [2, 32], strides = [1, 1]} : vector<2x64xf32> to vector<2x32xf32>
    %365 = vector.shape_cast %359 : vector<2x1xi1> to vector<2x1xi1>
    %366 = vector.broadcast %365 : vector<2x1xi1> to vector<2x32xi1>
    %367 = arith.select %366, %353, %364 : vector<2x32xi1>, vector<2x32xf32>
    %368 = tpu.concatenate %363, %367 in 1 : vector<2x32xf32>, vector<2x32xf32> -> vector<2x64xf32>
    %369 = vector.extract_strided_slice %314 {offsets = [0, 0], sizes = [2, 32], strides = [1, 1]} : vector<2x64xf32> to vector<2x32xf32>
    %370 = vector.shape_cast %357 : vector<2x1xi1> to vector<2x1xi1>
    %371 = vector.broadcast %370 : vector<2x1xi1> to vector<2x32xi1>
    %372 = arith.select %371, %345, %369 : vector<2x32xi1>, vector<2x32xf32>
    %373 = vector.extract_strided_slice %314 {offsets = [0, 32], sizes = [2, 32], strides = [1, 1]} : vector<2x64xf32> to vector<2x32xf32>
    %374 = vector.shape_cast %359 : vector<2x1xi1> to vector<2x1xi1>
    %375 = vector.broadcast %374 : vector<2x1xi1> to vector<2x32xi1>
    %376 = arith.select %375, %355, %373 : vector<2x32xi1>, vector<2x32xf32>
    %377 = tpu.concatenate %372, %376 in 1 : vector<2x32xf32>, vector<2x32xf32> -> vector<2x64xf32>
    %cst_49 = arith.constant 0.000000e+00 : f32
    %378 = vector.shape_cast %357 : vector<2x1xi1> to vector<2x1xi1>
    %379 = vector.broadcast %378 : vector<2x1xi1> to vector<2x32xi1>
    %380 = vector.broadcast %cst_49 : f32 to vector<2x32xf32>
    %381 = arith.select %379, %345, %380 : vector<2x32xi1>, vector<2x32xf32>
    %c10_50 = arith.constant 10 : index
    %c0_51 = arith.constant 0 : index
    %382 = vector.load %arg6[%c10_50, %c0_51] : memref<16x64xf32, #tpu.memory_space<vmem>>, vector<2x32xf32>
    tpu.vector_store %arg6[%c10_50, %c0_51], %381 {strides = array<i32>} : memref<16x64xf32, #tpu.memory_space<vmem>>, vector<2x32xf32>,
    %cst_52 = arith.constant 0.000000e+00 : f32
    %383 = vector.shape_cast %359 : vector<2x1xi1> to vector<2x1xi1>
    %384 = vector.broadcast %383 : vector<2x1xi1> to vector<2x32xi1>
    %385 = vector.broadcast %cst_52 : f32 to vector<2x32xf32>
    %386 = arith.select %384, %355, %385 : vector<2x32xi1>, vector<2x32xf32>
    %c4_53 = arith.constant 4 : index
    %c32_54 = arith.constant 32 : index
    %387 = vector.load %arg6[%c4_53, %c32_54] : memref<16x64xf32, #tpu.memory_space<vmem>>, vector<2x32xf32>
    tpu.vector_store %arg6[%c4_53, %c32_54], %386 {strides = array<i32>} : memref<16x64xf32, #tpu.memory_space<vmem>>, vector<2x32xf32>,
    %cst_55 = arith.constant dense<0.000000e+00> : vector<2x256xf32>
    %388 = tpu.matmul %377, %7, %cst_55 {dimension_numbers = #tpu.dot_dimension_numbers<[1], [0], [0], [1], [0, 0, 1, 1], [], []>} : vector<2x64xf32>, vector<64x256xf32>, vector<2x256xf32> -> vector<2x256xf32>
    %389 = vector.extract_strided_slice %5 {offsets = [12, 0], sizes = [2, 128], strides = [1, 1]} : vector<16x256xf32> to vector<2x128xf32>
    %390 = vector.extract_strided_slice %5 {offsets = [2, 128], sizes = [2, 128], strides = [1, 1]} : vector<16x256xf32> to vector<2x128xf32>
    %391 = tpu.concatenate %389, %390 in 1 : vector<2x128xf32>, vector<2x128xf32> -> vector<2x256xf32>
    %392 = arith.addf %388, %391 : vector<2x256xf32>
    %393 = arith.negf %392 : vector<2x256xf32>
    %394 = math.exp %393 : vector<2x256xf32>
    %cst_56 = arith.constant 1.000000e+00 : f32
    %395 = vector.broadcast %cst_56 : f32 to vector<2x256xf32>
    %396 = arith.addf %395, %394 : vector<2x256xf32>
    %397 = arith.divf %395, %396 : vector<2x256xf32>
    %398 = math.tanh %392 : vector<2x256xf32>
    %399 = vector.extract_strided_slice %368 {offsets = [0, 0], sizes = [2, 32], strides = [1, 1]} : vector<2x64xf32> to vector<2x32xf32>
    %400 = vector.extract_strided_slice %397 {offsets = [0, 0], sizes = [2, 32], strides = [1, 1]} : vector<2x256xf32> to vector<2x32xf32>
    %401 = vector.extract_strided_slice %397 {offsets = [0, 32], sizes = [2, 32], strides = [1, 1]} : vector<2x256xf32> to vector<2x32xf32>
    %402 = vector.extract_strided_slice %398 {offsets = [0, 64], sizes = [2, 32], strides = [1, 1]} : vector<2x256xf32> to vector<2x32xf32>
    %403 = vector.extract_strided_slice %397 {offsets = [0, 96], sizes = [2, 32], strides = [1, 1]} : vector<2x256xf32> to vector<2x32xf32>
    %404 = arith.mulf %401, %399 : vector<2x32xf32>
    %405 = arith.mulf %400, %402 : vector<2x32xf32>
    %406 = arith.addf %404, %405 : vector<2x32xf32>
    %407 = math.tanh %406 : vector<2x32xf32>
    %408 = arith.mulf %403, %407 : vector<2x32xf32>
    %409 = vector.extract_strided_slice %368 {offsets = [0, 32], sizes = [2, 32], strides = [1, 1]} : vector<2x64xf32> to vector<2x32xf32>
    %410 = vector.extract_strided_slice %397 {offsets = [0, 128], sizes = [2, 32], strides = [1, 1]} : vector<2x256xf32> to vector<2x32xf32>
    %411 = vector.extract_strided_slice %397 {offsets = [0, 160], sizes = [2, 32], strides = [1, 1]} : vector<2x256xf32> to vector<2x32xf32>
    %412 = vector.extract_strided_slice %398 {offsets = [0, 192], sizes = [2, 32], strides = [1, 1]} : vector<2x256xf32> to vector<2x32xf32>
    %413 = vector.extract_strided_slice %397 {offsets = [0, 224], sizes = [2, 32], strides = [1, 1]} : vector<2x256xf32> to vector<2x32xf32>
    %414 = arith.mulf %411, %409 : vector<2x32xf32>
    %415 = arith.mulf %410, %412 : vector<2x32xf32>
    %416 = arith.addf %414, %415 : vector<2x32xf32>
    %417 = math.tanh %416 : vector<2x32xf32>
    %418 = arith.mulf %413, %417 : vector<2x32xf32>
    %c6_i32_57 = arith.constant 6 : i32
    %419 = vector.broadcast %c6_i32_57 : i32 to vector<2x1xi32>
    %420 = arith.cmpi sgt, %6, %419 : vector<2x1xi32>
    %c1_i32_58 = arith.constant 1 : i32
    %421 = vector.broadcast %c1_i32_58 : i32 to vector<2x1xi32>
    %422 = arith.cmpi sgt, %6, %421 : vector<2x1xi32>
    %423 = vector.extract_strided_slice %368 {offsets = [0, 0], sizes = [2, 32], strides = [1, 1]} : vector<2x64xf32> to vector<2x32xf32>
    %424 = vector.shape_cast %420 : vector<2x1xi1> to vector<2x1xi1>
    %425 = vector.broadcast %424 : vector<2x1xi1> to vector<2x32xi1>
    %426 = arith.select %425, %406, %423 : vector<2x32xi1>, vector<2x32xf32>
    %427 = vector.extract_strided_slice %368 {offsets = [0, 32], sizes = [2, 32], strides = [1, 1]} : vector<2x64xf32> to vector<2x32xf32>
    %428 = vector.shape_cast %422 : vector<2x1xi1> to vector<2x1xi1>
    %429 = vector.broadcast %428 : vector<2x1xi1> to vector<2x32xi1>
    %430 = arith.select %429, %416, %427 : vector<2x32xi1>, vector<2x32xf32>
    %431 = tpu.concatenate %426, %430 in 1 : vector<2x32xf32>, vector<2x32xf32> -> vector<2x64xf32>
    %432 = vector.extract_strided_slice %377 {offsets = [0, 0], sizes = [2, 32], strides = [1, 1]} : vector<2x64xf32> to vector<2x32xf32>
    %433 = vector.shape_cast %420 : vector<2x1xi1> to vector<2x1xi1>
    %434 = vector.broadcast %433 : vector<2x1xi1> to vector<2x32xi1>
    %435 = arith.select %434, %408, %432 : vector<2x32xi1>, vector<2x32xf32>
    %436 = vector.extract_strided_slice %377 {offsets = [0, 32], sizes = [2, 32], strides = [1, 1]} : vector<2x64xf32> to vector<2x32xf32>
    %437 = vector.shape_cast %422 : vector<2x1xi1> to vector<2x1xi1>
    %438 = vector.broadcast %437 : vector<2x1xi1> to vector<2x32xi1>
    %439 = arith.select %438, %418, %436 : vector<2x32xi1>, vector<2x32xf32>
    %440 = tpu.concatenate %435, %439 in 1 : vector<2x32xf32>, vector<2x32xf32> -> vector<2x64xf32>
    %cst_59 = arith.constant 0.000000e+00 : f32
    %441 = vector.shape_cast %420 : vector<2x1xi1> to vector<2x1xi1>
    %442 = vector.broadcast %441 : vector<2x1xi1> to vector<2x32xi1>
    %443 = vector.broadcast %cst_59 : f32 to vector<2x32xf32>
    %444 = arith.select %442, %408, %443 : vector<2x32xi1>, vector<2x32xf32>
    %c12_60 = arith.constant 12 : index
    %c0_61 = arith.constant 0 : index
    %445 = vector.load %arg6[%c12_60, %c0_61] : memref<16x64xf32, #tpu.memory_space<vmem>>, vector<2x32xf32>
    tpu.vector_store %arg6[%c12_60, %c0_61], %444 {strides = array<i32>} : memref<16x64xf32, #tpu.memory_space<vmem>>, vector<2x32xf32>,
    %cst_62 = arith.constant 0.000000e+00 : f32
    %446 = vector.shape_cast %422 : vector<2x1xi1> to vector<2x1xi1>
    %447 = vector.broadcast %446 : vector<2x1xi1> to vector<2x32xi1>
    %448 = vector.broadcast %cst_62 : f32 to vector<2x32xf32>
    %449 = arith.select %447, %418, %448 : vector<2x32xi1>, vector<2x32xf32>
    %c2_63 = arith.constant 2 : index
    %c32_64 = arith.constant 32 : index
    %450 = vector.load %arg6[%c2_63, %c32_64] : memref<16x64xf32, #tpu.memory_space<vmem>>, vector<2x32xf32>
    tpu.vector_store %arg6[%c2_63, %c32_64], %449 {strides = array<i32>} : memref<16x64xf32, #tpu.memory_space<vmem>>, vector<2x32xf32>,
    %cst_65 = arith.constant dense<0.000000e+00> : vector<2x256xf32>
    %451 = tpu.matmul %440, %7, %cst_65 {dimension_numbers = #tpu.dot_dimension_numbers<[1], [0], [0], [1], [0, 0, 1, 1], [], []>} : vector<2x64xf32>, vector<64x256xf32>, vector<2x256xf32> -> vector<2x256xf32>
    %452 = vector.extract_strided_slice %5 {offsets = [14, 0], sizes = [2, 128], strides = [1, 1]} : vector<16x256xf32> to vector<2x128xf32>
    %453 = vector.extract_strided_slice %5 {offsets = [0, 128], sizes = [2, 128], strides = [1, 1]} : vector<16x256xf32> to vector<2x128xf32>
    %454 = tpu.concatenate %452, %453 in 1 : vector<2x128xf32>, vector<2x128xf32> -> vector<2x256xf32>
    %455 = arith.addf %451, %454 : vector<2x256xf32>
    %456 = arith.negf %455 : vector<2x256xf32>
    %457 = math.exp %456 : vector<2x256xf32>
    %cst_66 = arith.constant 1.000000e+00 : f32
    %458 = vector.broadcast %cst_66 : f32 to vector<2x256xf32>
    %459 = arith.addf %458, %457 : vector<2x256xf32>
    %460 = arith.divf %458, %459 : vector<2x256xf32>
    %461 = math.tanh %455 : vector<2x256xf32>
    %462 = vector.extract_strided_slice %431 {offsets = [0, 0], sizes = [2, 32], strides = [1, 1]} : vector<2x64xf32> to vector<2x32xf32>
    %463 = vector.extract_strided_slice %460 {offsets = [0, 0], sizes = [2, 32], strides = [1, 1]} : vector<2x256xf32> to vector<2x32xf32>
    %464 = vector.extract_strided_slice %460 {offsets = [0, 32], sizes = [2, 32], strides = [1, 1]} : vector<2x256xf32> to vector<2x32xf32>
    %465 = vector.extract_strided_slice %461 {offsets = [0, 64], sizes = [2, 32], strides = [1, 1]} : vector<2x256xf32> to vector<2x32xf32>
    %466 = vector.extract_strided_slice %460 {offsets = [0, 96], sizes = [2, 32], strides = [1, 1]} : vector<2x256xf32> to vector<2x32xf32>
    %467 = arith.mulf %464, %462 : vector<2x32xf32>
    %468 = arith.mulf %463, %465 : vector<2x32xf32>
    %469 = arith.addf %467, %468 : vector<2x32xf32>
    %470 = math.tanh %469 : vector<2x32xf32>
    %471 = arith.mulf %466, %470 : vector<2x32xf32>
    %472 = vector.extract_strided_slice %431 {offsets = [0, 32], sizes = [2, 32], strides = [1, 1]} : vector<2x64xf32> to vector<2x32xf32>
    %473 = vector.extract_strided_slice %460 {offsets = [0, 128], sizes = [2, 32], strides = [1, 1]} : vector<2x256xf32> to vector<2x32xf32>
    %474 = vector.extract_strided_slice %460 {offsets = [0, 160], sizes = [2, 32], strides = [1, 1]} : vector<2x256xf32> to vector<2x32xf32>
    %475 = vector.extract_strided_slice %461 {offsets = [0, 192], sizes = [2, 32], strides = [1, 1]} : vector<2x256xf32> to vector<2x32xf32>
    %476 = vector.extract_strided_slice %460 {offsets = [0, 224], sizes = [2, 32], strides = [1, 1]} : vector<2x256xf32> to vector<2x32xf32>
    %477 = arith.mulf %474, %472 : vector<2x32xf32>
    %478 = arith.mulf %473, %475 : vector<2x32xf32>
    %479 = arith.addf %477, %478 : vector<2x32xf32>
    %480 = math.tanh %479 : vector<2x32xf32>
    %481 = arith.mulf %476, %480 : vector<2x32xf32>
    %c7_i32_67 = arith.constant 7 : i32
    %482 = vector.broadcast %c7_i32_67 : i32 to vector<2x1xi32>
    %483 = arith.cmpi sgt, %6, %482 : vector<2x1xi32>
    %c0_i32_68 = arith.constant 0 : i32
    %484 = vector.broadcast %c0_i32_68 : i32 to vector<2x1xi32>
    %485 = arith.cmpi sgt, %6, %484 : vector<2x1xi32>
    %cst_69 = arith.constant 0.000000e+00 : f32
    %486 = vector.shape_cast %483 : vector<2x1xi1> to vector<2x1xi1>
    %487 = vector.broadcast %486 : vector<2x1xi1> to vector<2x32xi1>
    %488 = vector.broadcast %cst_69 : f32 to vector<2x32xf32>
    %489 = arith.select %487, %471, %488 : vector<2x32xi1>, vector<2x32xf32>
    %c14_70 = arith.constant 14 : index
    %c0_71 = arith.constant 0 : index
    %490 = vector.load %arg6[%c14_70, %c0_71] : memref<16x64xf32, #tpu.memory_space<vmem>>, vector<2x32xf32>
    tpu.vector_store %arg6[%c14_70, %c0_71], %489 {strides = array<i32>} : memref<16x64xf32, #tpu.memory_space<vmem>>, vector<2x32xf32>,
    %cst_72 = arith.constant 0.000000e+00 : f32
    %491 = vector.shape_cast %485 : vector<2x1xi1> to vector<2x1xi1>
    %492 = vector.broadcast %491 : vector<2x1xi1> to vector<2x32xi1>
    %493 = vector.broadcast %cst_72 : f32 to vector<2x32xf32>
    %494 = arith.select %492, %481, %493 : vector<2x32xi1>, vector<2x32xf32>
    %c0_73 = arith.constant 0 : index
    %c32_74 = arith.constant 32 : index
    %495 = vector.load %arg6[%c0_73, %c32_74] : memref<16x64xf32, #tpu.memory_space<vmem>>, vector<2x32xf32>
    tpu.vector_store %arg6[%c0_73, %c32_74], %494 {strides = array<i32>} : memref<16x64xf32, #tpu.memory_space<vmem>>, vector<2x32xf32>,
    return
  }
  func.func @transform_0(%arg0: i32) -> (i32, i32) {
    %c0_i32 = arith.constant 0 : i32
    %c0_i32_0 = arith.constant 0 : i32
    %c0_i32_1 = arith.constant 0 : i32
    return %c0_i32, %c0_i32_0 : i32, i32
  }
  func.func @transform_1(%arg0: i32) -> (i32, i32) {
    %c0_i32 = arith.constant 0 : i32
    %c0_i32_0 = arith.constant 0 : i32
    %c0_i32_1 = arith.constant 0 : i32
    return %c0_i32, %c0_i32_0 : i32, i32
  }
  func.func @transform_2(%arg0: i32) -> (i32, i32) {
    %c0_i32 = arith.constant 0 : i32
    %c0_i32_0 = arith.constant 0 : i32
    %c0_i32_1 = arith.constant 0 : i32
    return %c0_i32, %c0_i32_0 : i32, i32
  }
  func.func @transform_3(%arg0: i32) -> (i32, i32) {
    %c0_i32 = arith.constant 0 : i32
    %c0_i32_0 = arith.constant 0 : i32
    %c0_i32_1 = arith.constant 0 : i32
    return %c0_i32, %c0_i32_0 : i32, i32
  }
  func.func @transform_4(%arg0: i32) -> (i32, i32) {
    %c0_i32 = arith.constant 0 : i32
    %c0_i32_0 = arith.constant 0 : i32
    %c0_i32_1 = arith.constant 0 : i32
    return %c0_i32, %c0_i32_0 : i32, i32
  }
  func.func @transform_5(%arg0: i32) -> (i32, i32) {
    %c0_i32 = arith.constant 0 : i32
    %c0_i32_0 = arith.constant 0 : i32
    %c0_i32_1 = arith.constant 0 : i32
    return %c0_i32, %c0_i32_0 : i32, i32
  }
}

</mosaic_0001>

<bundles_post_ra>
// kernel: tpu_custom_call.1
= control target key start
LH: loop header
LB: loop body
LE: loop exit
PB: predicated region body
PF: predicated region fallthrough
CT: control target
= control target key end

     0   :  { %10 = vsyncpa [#allocation3], 0  ;;  %s2444_s0 = inlined_call_operand.hbm [shape: f32[16,32], index: 0, kind: input, shape index: {}]   ;;  %s2445_s1 = inlined_call_operand.hbm [shape: f32[32,256], index: 1, kind: input, shape index: {}]   ;;  %s2446_s2 = inlined_call_operand.hbm [shape: f32[64,256], index: 2, kind: input, shape index: {}]   ;;  %s2447_s3 = inlined_call_operand.vmem [shape: f32[1,256], index: 3, kind: input, shape index: {}]   ;;  %s2448_s4 = inlined_call_operand.vmem [shape: s32[2,1], index: 4, kind: input, shape index: {}]   ;;  %s2449_s5 = inlined_call_operand.hbm [shape: f32[16,64], index: 5, kind: output, shape index: {}]  }
   0x1   :  { %11 = vsyncpa [#allocation6], 0 }
   0x2   :  { %12 = vsyncpa [#allocation4], 0  ;;  %s1805_s18 = smov [#allocation5]  }
   0x3   :  { %s30_s19 = sshll.u32 %s1805_s18, 4  ;;  %s31_s19 = int_to_ptr.vmem [resolvable:$true] %s30_s19 }
   0x4   :  { %s1727_s20 = scalar_lea.vmem %s31_s19, 1024  ;;  %p1732_p1 = scmp.lt.s32.totalorder %s31_s19, %s31_s19 }
   0x5   :  { %p1728_p0 = scmp.ne.s32.totalorder %s31_s19, %s1727_s20  ;;  %p1733_p2 = scmp.lt.s32.totalorder %s1727_s20, %s1727_s20 }
   0x7   :  { %p1734_p3 = por %p1733_p2, %p1732_p1 }
   0x9   :  { %p1735_p4 = pnand %p1734_p3, %p1728_p0 }
   0xb   :  { %1738 = shalt.err (!%p1735_p4)
}
   0xc   :  { %s1806_s21 = smov 256   ;;  %s1807_s22 = smov 16  }
   0xd   :  { %36 = dma.hbm_to_vmem [thread:$0]  %s2445_s1, 1024, %s31_s19, [#allocation6], %s1806_s21, %s1806_s21, %s1807_s22  }
   0xe   :  { %s1808_s25 = smov [#allocation2]  }
   0xf   :  { %s18_s26 = sshll.u32 %s1808_s25, 4  ;;  %s19_s26 = int_to_ptr.vmem [resolvable:$true] %s18_s26 }
  0x10   :  { %s1747_s27 = scalar_lea.vmem %s19_s26, 256  ;;  %p1752_p6 = scmp.lt.s32.totalorder %s19_s26, %s19_s26 }
  0x11   :  { %p1748_p5 = scmp.ne.s32.totalorder %s19_s26, %s1747_s27  ;;  %p1753_p7 = scmp.lt.s32.totalorder %s1747_s27, %s1747_s27 }
  0x13   :  { %p1754_p8 = por %p1753_p7, %p1752_p6 }
  0x15   :  { %p1755_p9 = pnand %p1754_p8, %p1748_p5 }
  0x17   :  { %1758 = shalt.err (!%p1755_p9)
}
  0x18   :  { %s1809_s28 = smov 128   ;;  %s1810_s29 = smov 8  }
  0x19   :  { %24 = dma.hbm_to_vmem [thread:$0]  %s2444_s0, 256, %s19_s26, [#allocation3], %s1809_s28, %s1809_s28, %s1810_s29  }
  0x1a   :  { %s1811_s1 = smov [#allocation7]  }
  0x1b   :  { %s42_s7 = sshll.u32 %s1811_s1, 4  ;;  %s43_s7 = int_to_ptr.vmem [resolvable:$true] %s42_s7 }
  0x1c   :  { %s1767_s8 = scalar_lea.vmem %s43_s7, 2048  ;;  %p1772_p11 = scmp.lt.s32.totalorder %s43_s7, %s43_s7 }
  0x1d   :  { %p1768_p10 = scmp.ne.s32.totalorder %s43_s7, %s1767_s8  ;;  %p1773_p12 = scmp.lt.s32.totalorder %s1767_s8, %s1767_s8 }
  0x1f   :  { %p1774_p13 = por %p1773_p12, %p1772_p11 }
  0x21   :  { %p1775_p0 = pnand %p1774_p13, %p1768_p10 }
  0x23   :  { %1778 = shalt.err (!%p1775_p0)
}
  0x24   :  { %48 = dma.hbm_to_vmem [thread:$0]  %s2446_s2, 2048, %s43_s7, [#allocation6], %s1806_s21, %s1806_s21, %s1807_s22  }
  0x25   :  { %1799 = dma.done.wait [#allocation3], 256  }
  0x26   :  { %1800 = vsyncadd [#allocation3], 4294967040 }
  0x27   :  { %1801 = dma.done.wait [#allocation6], 3072  }
  0x28   :  { %1802 = vsyncadd [#allocation6], 4294964224  ;;  %v1812_v0 = vmov 0.0   ;;  %v71_v1 = vld [vmem:[#allocation5 + $0x38] sm:$0xff]  ;;  %v70_v3 = vld [vmem:[#allocation5 + $0x30] sm:$0xff]  ;;  %vm84_vm0 = vcmask 261120   ;;  %v74_v28 = vlaneseq }
  0x29   :  { %155 = vmatprep.mubr.f32.mxu0 %v1812_v0  ;;  %256 = vmatprep.mubr.f32.mxu1 %v1812_v0  ;;  %v1862_v2 = vld [vmem:[#allocation7 + $0x78] sm:$0xff]  ;;  %v1865_v4 = vld [vmem:[#allocation7 + $0x70] sm:$0xff]  ;;  %v69_v5 = vld [vmem:[#allocation5 + $0x28] sm:$0xff]  ;;  %v1813_v27 = vmov 0   ;;  %s1814_s12 = smov 64   ;;  %s1816_s13 = smov 96  }
  0x2a   :  { %115 = vmatprep.subr.mxu0 %v71_v1  ;;  %208 = vmatprep.subr.mxu1 %v1862_v2  ;;  %v1867_v6 = vld [vmem:[#allocation7 + $0x68] sm:$0xff]  ;;  %v68_v7 = vld [vmem:[#allocation5 + $0x20] sm:$0xff]  ;;  %v67_v9 = vld [vmem:[#allocation5 + $0x18] sm:$0xff]  ;;  %v75_v29 = vshrl.u32 %v74_v28, 7  ;;  %vm341_vm5 = vcmask 254976   ;;  %vm343_vm6 = vcmask 517376  }
  0x2b   :  { %116 = vmatpush1.msra.mxu0 %v70_v3  ;;  %209 = vmatpush1.msra.mxu1 %v1865_v4  ;;  %v1870_v8 = vld [vmem:[#allocation7 + $0x60] sm:$0xff]  ;;  %v1873_v10 = vld [vmem:[#allocation7 + $0x58] sm:$0xff]  ;;  %v66_v11 = vld [vmem:[#allocation5 + $0x10] sm:$0xff]  ;;  %vm188_vm7 = vcmask 523264   ;;  %s1817_s14 = smov [#allocation8]  }
  0x2c   :  { %117 = vmatprep.subr.mxu0 %v69_v5  ;;  %210 = vmatprep.subr.mxu1 %v1867_v6  ;;  %v1875_v12 = vld [vmem:[#allocation7 + $0x50] sm:$0xff]  ;;  %v65_v13 = vld [vmem:[#allocation5 + $0x8] sm:$0xff]  ;;  %v64_v15 = vld [vmem:[#allocation5] sm:$0xff]  ;;  %v80_v30 = vsub.s32 1, %v75_v29  ;;  %v76_v32 = vsub.s32 0, %v75_v29  ;;  %s1527_s15 = sshll.u32 %s1817_s14, 4  ;;  %s1528_s15 = int_to_ptr.vmem [resolvable:$true] %s1527_s15 }
  0x2d   :  { %118 = vmatpush1.msra.mxu0 %v68_v7  ;;  %211 = vmatpush1.msra.mxu1 %v1870_v8  ;;  %v1878_v14 = vld [vmem:[#allocation7 + $0x48] sm:$0xff]  ;;  %v1881_v16 = vld [vmem:[#allocation7 + $0x40] sm:$0xff]  ;;  %v62_v17 = vld [vmem:[#allocation2] sm:$0xff]  ;;  %s1779_s16 = scalar_lea.vmem %s1528_s15, 256  ;;  %p1784_p2 = scmp.lt.s32.totalorder %s1528_s15, %s1528_s15 }
  0x2e   :  { %119 = vmatprep.subr.mxu0 %v67_v9  ;;  %212 = vmatprep.subr.mxu1 %v1873_v10  ;;  %v1884_v18 = vld [vmem:[#allocation7 + $0x38] sm:$0xff]  ;;  %v1887_v19 = vld [vmem:[#allocation7 + $0x30] sm:$0xff]  ;;  %v1890_v20 = vld [vmem:[#allocation7 + $0x28] sm:$0xff]  ;;  %p1780_p1 = scmp.ne.s32.totalorder %s1528_s15, %s1779_s16  ;;  %p1785_p3 = scmp.lt.s32.totalorder %s1779_s16, %s1779_s16 }
  0x2f   :  { %120 = vmatpush1.msra.mxu0 %v66_v11  ;;  %213 = vmatpush1.msra.mxu1 %v1875_v12  ;;  %v1894_v21 = vld [vmem:[#allocation7 + $0x20] sm:$0xff]  ;;  %v63_v22 = vld [vmem:[#allocation2 + $0x8] sm:$0xff]  ;;  %v1901_v24 = vld [vmem:[#allocation7 + $0x10] sm:$0xff] }
  0x30   :  { %121 = vmatprep.subr.mxu0 %v65_v13  ;;  %214 = vmatprep.subr.mxu1 %v1878_v14  ;;  %v1898_v23 = vld [vmem:[#allocation7 + $0x18] sm:$0xff]  ;;  %v1905_v25 = vld [vmem:[#allocation7 + $0x8] sm:$0xff]  ;;  %v1910_v26 = vld [vmem:[#allocation7] sm:$0xff]  ;;  %p1786_p4 = por %p1785_p3, %p1784_p2 }
  0x31   :  { %122 = vmatpush1.msra.mxu0 %v64_v15  ;;  %215 = vmatpush1.msra.mxu1 %v1881_v16  ;;  %v72_v31 = vld [vmem:[%s2447_s3] sm:$0x3] }
  0x32   :  { %1540 = vmatmul.mubr.msk.f32.vlgmr.msra.gmra.mxu0 %vm84_vm0, %v62_v17  ;;  %216 = vmatprep.subr.mxu1 %v1884_v18  ;;  %v81_v33 = vrot.slane %v72_v31, %v80_v30  ;;  %v77_v36 = vrot.slane %v72_v31, %v76_v32  ;;  %v1970_v49 = vld [vmem:[%s2448_s4] sm:$0x3]  ;;  %s1815_s4 = smov 32   ;;  %p1787_p5 = pnand %p1786_p4, %p1780_p1 }
  0x33   :  { %217 = vmatpush1.msra.mxu1 %v1887_v19  ;;  %161 = vmatprep.mubr.f32.mxu0 %v1812_v0  ;;  %vm311_vm1 = vcmp.gt.s32.totalorder %v1970_v49, 0  ;;  %vm312_vm2 = vcmp.gt.s32.totalorder %v1970_v49, 7  ;;  %vm477_vm8 = vcmp.gt.s32.totalorder %v1970_v49, 1  ;;  %vm478_vm9 = vcmp.gt.s32.totalorder %v1970_v49, 6 }
  0x34   :  { %218 = vmatprep.subr.mxu1 %v1890_v20  ;;  %370 = vmatprep.subr.mxu0 %v1862_v2  ;;  %v313_v51 = vsel %vm311_vm1, 1, %v1813_v27  ;;  %v319_v1 = vsel %vm312_vm2, 1, %v1813_v27  ;;  %vm655_vm12 = vcmp.gt.s32.totalorder %v1970_v49, 2  ;;  %vm656_vm13 = vcmp.gt.s32.totalorder %v1970_v49, 5 }
  0x35   :  { %219 = vmatpush1.msra.mxu1 %v1894_v21  ;;  %371 = vmatpush1.msra.mxu0 %v1865_v4  ;;  %vm833_vm1 = vcmp.gt.s32.totalorder %v1970_v49, 3  ;;  %vm834_vm2 = vcmp.gt.s32.totalorder %v1970_v49, 4 }
  0x36   :  { %1541 = vmatmul.mubr.msk.f32.gmra.mxu0 %vm84_vm0, %v63_v22  ;;  %220 = vmatprep.subr.mxu1 %v1898_v23 }
  0x37   :  { %221 = vmatpush1.msra.mxu1 %v1901_v24  ;;  %372 = vmatprep.subr.mxu0 %v1867_v6 }
  0x38   :  { %222 = vmatprep.subr.mxu1 %v1905_v25  ;;  %373 = vmatpush1.msra.mxu0 %v1870_v8 }
  0x39   :  { %223 = vmatpush1.msra.mxu1 %v1910_v26  ;;  %374 = vmatprep.subr.mxu0 %v1873_v10 }
  0x3a   :  { %257 = vmatmul.mubr.f32.vlgmr.msra.gmra.mxu1 %v1812_v0  ;;  %375 = vmatpush1.msra.mxu0 %v1875_v12 }
  0x3b   :  { %376 = vmatprep.subr.mxu0 %v1878_v14  ;;  %418 = vmatprep.mubr.f32.mxu0 %v1812_v0 }
  0x3c   :  { %377 = vmatpush1.msra.mxu0 %v1881_v16  ;;  %548 = vmatprep.subr.mxu1 %v1862_v2 }
  0x3d   :  { %378 = vmatprep.subr.mxu0 %v1884_v18  ;;  %549 = vmatpush1.msra.mxu1 %v1865_v4 }
  0x3e   :  { %379 = vmatpush1.msra.mxu0 %v1887_v19  ;;  %550 = vmatprep.subr.mxu1 %v1867_v6 }
  0x3f   :  { %380 = vmatprep.subr.mxu0 %v1890_v20  ;;  %551 = vmatpush1.msra.mxu1 %v1870_v8 }
  0x40   :  { %381 = vmatpush1.msra.mxu0 %v1894_v21  ;;  %552 = vmatprep.subr.mxu1 %v1873_v10 }
  0x41   :  { %382 = vmatprep.subr.mxu0 %v1898_v23  ;;  %553 = vmatpush1.msra.mxu1 %v1875_v12 }
  0x42   :  { %383 = vmatpush1.msra.mxu0 %v1901_v24  ;;  %554 = vmatprep.subr.mxu1 %v1878_v14 }
  0x43   :  { %384 = vmatprep.subr.mxu0 %v1905_v25  ;;  %555 = vmatpush1.msra.mxu1 %v1881_v16 }
  0x44   :  { %385 = vmatpush1.msra.mxu0 %v1910_v26  ;;  %556 = vmatprep.subr.mxu1 %v1884_v18 }
  0x45   :  { %557 = vmatpush1.msra.mxu1 %v1887_v19  ;;  %596 = vmatprep.mubr.f32.mxu1 %v1812_v0 }
  0x46   :  { %558 = vmatprep.subr.mxu1 %v1890_v20  ;;  %726 = vmatprep.subr.mxu0 %v1862_v2 }
  0x47   :  { %559 = vmatpush1.msra.mxu1 %v1894_v21  ;;  %1578 = vset.pattern.permute.xlu0 %v1813_v27 }
  0x48   :  { %560 = vmatprep.subr.mxu1 %v1898_v23  ;;  %1579 = vset.pattern.permute.xlu1 %v1813_v27 }
  0x49   :  { %561 = vmatpush1.msra.mxu1 %v1901_v24 }
  0x4a   :  { %562 = vmatprep.subr.mxu1 %v1905_v25 }
  0x4b   :  { %563 = vmatpush1.msra.mxu1 %v1910_v26 }
  0x4c   :  { %903 = vmatprep.subr.mxu1 %v1862_v2 }
  0xf2   :  { %v157_v34 = vpop.f32.mrf.mxu0 }
  0xf3   :  { %v1959_v41 = vadd.f32 %v157_v34, %v77_v36 }
  0xf4   :  { %v159_v35 = vpop.f32.mrf.mxu0 }
  0xf5   :  { %v1955_v37 = vadd.f32 %v159_v35, %v81_v33 }
  0xf6   :  { %v163_v38 = vpop.f32.mrf.mxu0 }
  0xf7   :  { %v1957_v39 = vadd.f32 %v163_v38, %v77_v36 }
  0xf8   :  { %v165_v40 = vpop.f32.mrf.mxu0 }
  0xf9   :  { %v1961_v42 = vadd.f32 %v165_v40, %v81_v33 }
  0xfa   :  { %v258_v43 = vpop.f32.mrf.mxu1 }
  0xfb   :  { %v259_v44 = vadd.f32 %v258_v43, %v1959_v41  ;;  %v186_v45 = vrot.slane %v1961_v42, 6  ;;  %v345_v43 = vrot.slane %v1961_v42, 2 }
  0xfc   :  { %v260_v46 = vpop.f32.mrf.mxu1 }
  0xfd   :  { %1580 = vtanh.f32 %v259_v44  ;;  %v261_v47 = vadd.f32 %v260_v46, %v186_v45  ;;  %v1542_v52 = vmul.f32 -1.442695, %v259_v44  ;;  %v347_v44 = vrot.slane %v1959_v41, 2 }
  0xff   :  { %1582 = vtanh.f32 %v261_v47  ;;  %v1543_v53 = vmul.f32 -1.442695, %v261_v47 }
 0x100   :  { %1584 = vpow2.f32 %v1542_v52 }
 0x101   :  { %1586 = vpow2.f32 %v1543_v53 }
 0x10a   :  { %v1581_v48 = vpop.eup %1580 }
 0x10b   :  { %279 = vrot.lane.b32.xlu0 %v1581_v48, %s1814_s12  ;;  %v348_v48 = vrot.slane %v345_v43, 2 }
 0x10c   :  { %v1583_v50 = vpop.eup %1582 }
 0x10d   :  { %v1585_v54 = vpop.eup %1584 }
 0x10e   :  { %v269_v55 = vadd.f32 1.0, %v1585_v54  ;;  %v1587_v56 = vpop.eup %1586 }
 0x10f   :  { %296 = vrot.lane.b32.xlu0 %v1583_v50, %s1814_s12  ;;  %v270_v57 = vadd.f32 1.0, %v1587_v56 }
 0x110   :  { %1588 = vrcp.f32 %v269_v55 }
 0x111   :  { %1590 = vrcp.f32 %v270_v57 }
 0x113   :  { %315 = vperm.xlu0 %1578, %v313_v51  }
 0x11d   :  { %v1589_v58 = vpop.eup %1588 }
 0x11e   :  { %v1591_v61 = vpop.eup %1590  ;;  %v277_v3 = vmul.f32 0.0, %v1589_v58 }
 0x11f   :  { %v294_v9 = vmul.f32 0.0, %v1591_v61 }
 0x17d   :  { %v280_v59 = vpop.permute.xlu0 %279 }
 0x17e   :  { %v282_v60 = vmul.f32 %v1589_v58, %v280_v59 }
 0x180   :  { %284 = vrot.lane.b32.xlu1 %v282_v60, %s1815_s4 }
 0x181   :  { %v297_v62 = vpop.permute.xlu0 %296 }
 0x182   :  { %v299_v63 = vmul.f32 %v1591_v61, %v297_v62 }
 0x184   :  { %301 = vrot.lane.b32.xlu1 %v299_v63, %s1815_s4 }
 0x188   :  { %321 = vperm.xlu1 %1579, %v319_v1  }
 0x18e   :  { %v1984_v28 = vpop.permute.xlu0 %315 }
 0x18f   :  { %vm317_vm3 = vcmp.eq.s32.totalorder %v1984_v28, 1 }
 0x1f2   :  { %v285_v5 = vpop.permute.xlu1 %284 }
 0x1f3   :  { %v287_v7 = vadd.f32 %v285_v5, %v277_v3 }
 0x1f5   :  { %1592 = vtanh.f32 %v287_v7  ;;  %v318_v35 = vsel %vm317_vm3, %v287_v7, 0.0 }
 0x1f6   :  { %v302_v11 = vpop.permute.xlu1 %301 }
 0x1f7   :  { %v304_v13 = vadd.f32 %v302_v11, %v294_v9  ;;  %v479_v11 = vsel %vm477_vm8, 1, %v1813_v27 }
 0x1f9   :  { %1594 = vtanh.f32 %v304_v13 }
 0x202   :  { %v1593_v15 = vpop.eup %1592 }
 0x203   :  { %290 = vrot.lane.b32.xlu1 %v1593_v15, %s1814_s12  ;;  %v1982_v22 = vpop.permute.xlu1 %321 }
 0x204   :  { %vm323_vm4 = vcmp.eq.s32.totalorder %v1982_v22, 1 }
 0x205   :  { %v324_v55 = vsel %vm323_vm4, %v304_v13, 0.0  ;;  %v485_v13 = vsel %vm478_vm9, 1, %v1813_v27 }
 0x206   :  { %v1595_v17 = vpop.eup %1594 }
 0x207   :  { %307 = vrot.lane.b32.xlu0 %v1595_v17, %s1814_s12 }
 0x275   :  { %v291_v29 = vpop.permute.xlu1 %290 }
 0x276   :  { %v293_v30 = vmul.f32 %v1589_v58, %v291_v29 }
 0x278   :  { %v330_v31 = vsel %vm317_vm3, %v293_v30, 0.0 }
 0x279   :  { %v308_v32 = vpop.permute.xlu0 %307  ;;  %333 = vrot.lane.b32.xlu1 %v330_v31, %s1815_s4 }
 0x27a   :  { %v310_v33 = vmul.f32 %v1591_v61, %v308_v32 }
 0x27c   :  { %v331_v34 = vsel %vm323_vm4, %v310_v33, 0.0 }
 0x27d   :  { %337 = vrot.lane.b32.xlu0 %v331_v34, %s1814_s12  ;;  %326 = vrot.lane.b32.xlu1 %v318_v35, %s1816_s13 }
 0x2eb   :  { %v334_v36 = vpop.permute.xlu1 %333 }
 0x2ec   :  { %342 = vst.msk [vmem:[#allocation8] sm:$0x3] %vm341_vm5, %v334_v36 }
 0x2ef   :  { %v338_v38 = vpop.permute.xlu0 %337  ;;  %v327_v53 = vpop.permute.xlu1 %326 }
 0x2f0   :  { %v1999_v40 = vsel %vm84_vm0, %v334_v36, %v338_v38  ;;  %344 = vst.msk [vmem:[#allocation8 + $0xe] sm:$0x3] %vm343_vm6, %v338_v38  ;;  %v2030_v56 = vsel %vm84_vm0, %v327_v53, %v324_v55 }
 0x2f1   :  { %1544 = vmatmul.mubr.msk.f32.vlgmr.msra.gmra.mxu0 %vm188_vm7, %v1999_v40 }
 0x2f2   :  { %727 = vmatpush1.msra.mxu0 %v1865_v4  ;;  %774 = vmatprep.mubr.f32.mxu0 %v1812_v0 }
 0x2f3   :  { %728 = vmatprep.subr.mxu0 %v1867_v6 }
 0x2f4   :  { %729 = vmatpush1.msra.mxu0 %v1870_v8 }
 0x2f5   :  { %730 = vmatprep.subr.mxu0 %v1873_v10 }
 0x2f6   :  { %731 = vmatpush1.msra.mxu0 %v1875_v12 }
 0x2f7   :  { %732 = vmatprep.subr.mxu0 %v1878_v14 }
 0x2f8   :  { %733 = vmatpush1.msra.mxu0 %v1881_v16 }
 0x2f9   :  { %734 = vmatprep.subr.mxu0 %v1884_v18 }
 0x2fa   :  { %735 = vmatpush1.msra.mxu0 %v1887_v19 }
 0x2fb   :  { %736 = vmatprep.subr.mxu0 %v1890_v20 }
 0x2fc   :  { %737 = vmatpush1.msra.mxu0 %v1894_v21 }
 0x2fd   :  { %738 = vmatprep.subr.mxu0 %v1898_v23 }
 0x2fe   :  { %739 = vmatpush1.msra.mxu0 %v1901_v24 }
 0x2ff   :  { %740 = vmatprep.subr.mxu0 %v1905_v25 }
 0x300   :  { %741 = vmatpush1.msra.mxu0 %v1910_v26 }
 0x301   :  { %1071 = vmatprep.subr.mxu0 %v1862_v2 }
 0x3b1   :  { %v420_v46 = vpop.f32.mrf.mxu0 }
 0x3b2   :  { %v421_v47 = vadd.f32 %v420_v46, %v347_v44 }
 0x3b3   :  { %v422_v50 = vpop.f32.mrf.mxu0 }
 0x3b4   :  { %1596 = vtanh.f32 %v421_v47  ;;  %v423_v51 = vadd.f32 %v422_v50, %v348_v48  ;;  %v1545_v57 = vmul.f32 -1.442695, %v421_v47 }
 0x3b6   :  { %1598 = vtanh.f32 %v423_v51  ;;  %v1546_v58 = vmul.f32 -1.442695, %v423_v51 }
 0x3b7   :  { %1600 = vpow2.f32 %v1545_v57 }
 0x3b8   :  { %1602 = vpow2.f32 %v1546_v58  ;;  %v525_v58 = vrot.slane %v1959_v41, 4 }
 0x3c1   :  { %v1597_v52 = vpop.eup %1596 }
 0x3c2   :  { %445 = vrot.lane.b32.xlu0 %v1597_v52, %s1814_s12 }
 0x3c3   :  { %v1599_v54 = vpop.eup %1598 }
 0x3c4   :  { %462 = vrot.lane.b32.xlu1 %v1599_v54, %s1814_s12  ;;  %v1601_v59 = vpop.eup %1600 }
 0x3c5   :  { %v1603_v60 = vpop.eup %1602  ;;  %v431_v61 = vadd.f32 1.0, %v1601_v59 }
 0x3c6   :  { %440 = vrot.lane.b32.xlu0 %v2030_v56, %s1815_s4  ;;  %v432_v62 = vadd.f32 1.0, %v1603_v60 }
 0x3c7   :  { %1604 = vrcp.f32 %v431_v61  ;;  %v526_v61 = vrot.slane %v186_v45, 4 }
 0x3c8   :  { %1606 = vrcp.f32 %v432_v62 }
 0x3d4   :  { %v1605_v63 = vpop.eup %1604 }
 0x3d5   :  { %v1607_v5 = vpop.eup %1606 }
 0x3d6   :  { %v460_v31 = vmul.f32 %v1607_v5, %v2030_v56 }
 0x434   :  { %v446_v1 = vpop.permute.xlu0 %445 }
 0x435   :  { %v448_v3 = vmul.f32 %v1605_v63, %v446_v1 }
 0x436   :  { %v463_v7 = vpop.permute.xlu1 %462 }
 0x437   :  { %450 = vrot.lane.b32.xlu1 %v448_v3, %s1815_s4  ;;  %v465_v9 = vmul.f32 %v1607_v5, %v463_v7 }
 0x438   :  { %v441_v15 = vpop.permute.xlu0 %440 }
 0x439   :  { %467 = vrot.lane.b32.xlu0 %v465_v9, %s1815_s4  ;;  %v443_v17 = vmul.f32 %v1605_v63, %v441_v15 }
 0x43b   :  { %481 = vperm.xlu1 %1579, %v479_v11  }
 0x43d   :  { %487 = vperm.xlu0 %1578, %v485_v13  }
 0x4a9   :  { %v451_v29 = vpop.permute.xlu1 %450 }
 0x4aa   :  { %v453_v30 = vadd.f32 %v451_v29, %v443_v17 }
 0x4ab   :  { %v468_v32 = vpop.permute.xlu0 %467 }
 0x4ac   :  { %1608 = vtanh.f32 %v453_v30  ;;  %v470_v33 = vadd.f32 %v468_v32, %v460_v31 }
 0x4ae   :  { %1610 = vtanh.f32 %v470_v33 }
 0x4b6   :  { %v2047_v36 = vpop.permute.xlu1 %481 }
 0x4b7   :  { %vm483_vm10 = vcmp.eq.s32.totalorder %v2047_v36, 1 }
 0x4b8   :  { %v2049_v38 = vpop.permute.xlu0 %487  ;;  %v484_v53 = vsel %vm483_vm10, %v453_v30, %v441_v15 }
 0x4b9   :  { %v1609_v34 = vpop.eup %1608  ;;  %vm489_vm11 = vcmp.eq.s32.totalorder %v2049_v38, 1 }
 0x4ba   :  { %456 = vrot.lane.b32.xlu1 %v1609_v34, %s1814_s12  ;;  %v490_v7 = vsel %vm489_vm11, %v470_v33, %v2030_v56 }
 0x4bb   :  { %v1611_v35 = vpop.eup %1610 }
 0x4bc   :  { %473 = vrot.lane.b32.xlu0 %v1611_v35, %s1814_s12  ;;  %v657_v35 = vsel %vm655_vm12, 1, %v1813_v27 }
 0x4be   :  { %496 = vrot.lane.b32.xlu1 %v1999_v40, %s1816_s13 }
 0x4c0   :  { %500 = vrot.lane.b32.xlu0 %v1999_v40, %s1814_s12 }
 0x52c   :  { %v457_v44 = vpop.permute.xlu1 %456 }
 0x52d   :  { %v2051_v46 = vmul.f32 %v1605_v63, %v457_v44  ;;  %v663_v44 = vsel %vm656_vm13, 1, %v1813_v27 }
 0x52e   :  { %v474_v47 = vpop.permute.xlu0 %473 }
 0x52f   :  { %v2057_v51 = vmul.f32 %v1607_v5, %v474_v47 }
 0x530   :  { %v497_v48 = vpop.permute.xlu1 %496 }
 0x531   :  { %v499_v50 = vsel %vm483_vm10, %v2051_v46, %v497_v48 }
 0x532   :  { %505 = vrot.lane.b32.xlu1 %v499_v50, %s1815_s4  ;;  %v501_v40 = vpop.permute.xlu0 %500 }
 0x533   :  { %v503_v52 = vsel %vm489_vm11, %v2057_v51, %v501_v40 }
 0x534   :  { %509 = vrot.lane.b32.xlu0 %v503_v52, %s1814_s12 }
 0x536   :  { %492 = vrot.lane.b32.xlu1 %v484_v53, %s1816_s13 }
 0x5a4   :  { %v506_v54 = vpop.permute.xlu1 %505 }
 0x5a6   :  { %v510_v55 = vpop.permute.xlu0 %509 }
 0x5a7   :  { %v2069_v57 = vsel %vm84_vm0, %v506_v54, %v510_v55 }
 0x5a8   :  { %1547 = vmatmul.mubr.msk.f32.vlgmr.msra.gmra.mxu1 %vm188_vm7, %v2069_v57  ;;  %v493_v3 = vpop.permute.xlu1 %492 }
 0x5a9   :  { %904 = vmatpush1.msra.mxu1 %v1865_v4  ;;  %951 = vmatprep.mubr.f32.mxu1 %v1812_v0  ;;  %v2099_v9 = vsel %vm84_vm0, %v493_v3, %v490_v7 }
 0x5aa   :  { %905 = vmatprep.subr.mxu1 %v1867_v6 }
 0x5ab   :  { %906 = vmatpush1.msra.mxu1 %v1870_v8 }
 0x5ac   :  { %907 = vmatprep.subr.mxu1 %v1873_v10 }
 0x5ad   :  { %908 = vmatpush1.msra.mxu1 %v1875_v12 }
 0x5ae   :  { %909 = vmatprep.subr.mxu1 %v1878_v14 }
 0x5af   :  { %910 = vmatpush1.msra.mxu1 %v1881_v16 }
 0x5b0   :  { %911 = vmatprep.subr.mxu1 %v1884_v18 }
 0x5b1   :  { %912 = vmatpush1.msra.mxu1 %v1887_v19 }
 0x5b2   :  { %913 = vmatprep.subr.mxu1 %v1890_v20 }
 0x5b3   :  { %914 = vmatpush1.msra.mxu1 %v1894_v21 }
 0x5b4   :  { %915 = vmatprep.subr.mxu1 %v1898_v23 }
 0x5b5   :  { %916 = vmatpush1.msra.mxu1 %v1901_v24 }
 0x5b6   :  { %917 = vmatprep.subr.mxu1 %v1905_v25 }
 0x5b7   :  { %918 = vmatpush1.msra.mxu1 %v1910_v26 }
 0x5b8   :  { %1237 = vmatprep.subr.mxu1 %v1862_v2 }
 0x668   :  { %v598_v59 = vpop.f32.mrf.mxu1 }
 0x669   :  { %v599_v60 = vadd.f32 %v598_v59, %v525_v58 }
 0x66a   :  { %v600_v62 = vpop.f32.mrf.mxu1 }
 0x66b   :  { %1612 = vtanh.f32 %v599_v60  ;;  %v601_v63 = vadd.f32 %v600_v62, %v526_v61  ;;  %v1548_v45 = vmul.f32 -1.442695, %v599_v60 }
 0x66d   :  { %1614 = vtanh.f32 %v601_v63  ;;  %v1549_v11 = vmul.f32 -1.442695, %v601_v63 }
 0x66e   :  { %1616 = vpow2.f32 %v1548_v45 }
 0x66f   :  { %1618 = vpow2.f32 %v1549_v11 }
 0x678   :  { %v1613_v1 = vpop.eup %1612 }
 0x679   :  { %623 = vrot.lane.b32.xlu0 %v1613_v1, %s1814_s12 }
 0x67a   :  { %v1615_v5 = vpop.eup %1614 }
 0x67b   :  { %640 = vrot.lane.b32.xlu1 %v1615_v5, %s1814_s12  ;;  %v1617_v13 = vpop.eup %1616 }
 0x67c   :  { %v1619_v15 = vpop.eup %1618  ;;  %v609_v17 = vadd.f32 1.0, %v1617_v13 }
 0x67d   :  { %618 = vrot.lane.b32.xlu0 %v2099_v9, %s1815_s4  ;;  %v610_v29 = vadd.f32 1.0, %v1619_v15 }
 0x67e   :  { %1620 = vrcp.f32 %v609_v17  ;;  %v703_v17 = vrot.slane %v1959_v41, 6 }
 0x67f   :  { %1622 = vrcp.f32 %v610_v29 }
 0x68b   :  { %v1621_v30 = vpop.eup %1620 }
 0x68c   :  { %v1623_v32 = vpop.eup %1622 }
 0x68d   :  { %v638_v52 = vmul.f32 %v1623_v32, %v2099_v9 }
 0x6eb   :  { %v624_v56 = vpop.permute.xlu0 %623 }
 0x6ec   :  { %v626_v31 = vmul.f32 %v1621_v30, %v624_v56  ;;  %v704_v56 = vrot.slane %v345_v43, 6 }
 0x6ed   :  { %v641_v33 = vpop.permute.xlu1 %640 }
 0x6ee   :  { %628 = vrot.lane.b32.xlu1 %v626_v31, %s1815_s4  ;;  %v643_v34 = vmul.f32 %v1623_v32, %v641_v33 }
 0x6ef   :  { %v619_v47 = vpop.permute.xlu0 %618 }
 0x6f0   :  { %645 = vrot.lane.b32.xlu0 %v643_v34, %s1815_s4  ;;  %v621_v48 = vmul.f32 %v1621_v30, %v619_v47 }
 0x6f2   :  { %659 = vperm.xlu1 %1579, %v657_v35  }
 0x6f4   :  { %665 = vperm.xlu0 %1578, %v663_v44  }
 0x760   :  { %v629_v50 = vpop.permute.xlu1 %628 }
 0x761   :  { %v631_v40 = vadd.f32 %v629_v50, %v621_v48 }
 0x762   :  { %v646_v53 = vpop.permute.xlu0 %645 }
 0x763   :  { %1624 = vtanh.f32 %v631_v40  ;;  %v648_v54 = vadd.f32 %v646_v53, %v638_v52 }
 0x765   :  { %1626 = vtanh.f32 %v648_v54 }
 0x76d   :  { %v2116_v59 = vpop.permute.xlu1 %659 }
 0x76e   :  { %vm661_vm14 = vcmp.eq.s32.totalorder %v2116_v59, 1 }
 0x76f   :  { %v2118_v60 = vpop.permute.xlu0 %665  ;;  %v662_v45 = vsel %vm661_vm14, %v631_v40, %v619_v47 }
 0x770   :  { %v1625_v55 = vpop.eup %1624  ;;  %vm667_vm15 = vcmp.eq.s32.totalorder %v2118_v60, 1 }
 0x771   :  { %634 = vrot.lane.b32.xlu1 %v1625_v55, %s1814_s12 }
 0x772   :  { %v1627_v58 = vpop.eup %1626 }
 0x773   :  { %651 = vrot.lane.b32.xlu0 %v1627_v58, %s1814_s12  ;;  %v835_v58 = vsel %vm833_vm1, 1, %v1813_v27 }
 0x775   :  { %674 = vrot.lane.b32.xlu1 %v2069_v57, %s1816_s13 }
 0x777   :  { %678 = vrot.lane.b32.xlu0 %v2069_v57, %s1814_s12 }
 0x7e3   :  { %v635_v61 = vpop.permute.xlu1 %634 }
 0x7e4   :  { %v2120_v62 = vmul.f32 %v1621_v30, %v635_v61  ;;  %v841_v61 = vsel %vm834_vm2, 1, %v1813_v27 }
 0x7e5   :  { %v652_v63 = vpop.permute.xlu0 %651 }
 0x7e6   :  { %v2126_v5 = vmul.f32 %v1623_v32, %v652_v63 }
 0x7e7   :  { %v675_v1 = vpop.permute.xlu1 %674 }
 0x7e8   :  { %v677_v3 = vsel %vm661_vm14, %v2120_v62, %v675_v1 }
 0x7e9   :  { %683 = vrot.lane.b32.xlu1 %v677_v3, %s1815_s4  ;;  %v679_v57 = vpop.permute.xlu0 %678 }
 0x7ea   :  { %v681_v7 = vsel %vm667_vm15, %v2126_v5, %v679_v57 }
 0x7eb   :  { %687 = vrot.lane.b32.xlu0 %v681_v7, %s1814_s12 }
 0x7ed   :  { %670 = vrot.lane.b32.xlu1 %v662_v45, %s1816_s13 }
 0x85b   :  { %v684_v11 = vpop.permute.xlu1 %683 }
 0x85d   :  { %v688_v13 = vpop.permute.xlu0 %687 }
 0x85e   :  { %v2138_v15 = vsel %vm84_vm0, %v684_v11, %v688_v13 }
 0x85f   :  { %1550 = vmatmul.mubr.msk.f32.vlgmr.msra.gmra.mxu0 %vm188_vm7, %v2138_v15  ;;  %v671_v34 = vpop.permute.xlu1 %670 }
 0x860   :  { %1072 = vmatpush1.msra.mxu0 %v1865_v4  ;;  %1119 = vmatprep.mubr.f32.mxu0 %v1812_v0 }
 0x861   :  { %1073 = vmatprep.subr.mxu0 %v1867_v6 }
 0x862   :  { %1074 = vmatpush1.msra.mxu0 %v1870_v8 }
 0x863   :  { %1075 = vmatprep.subr.mxu0 %v1873_v10 }
 0x864   :  { %1076 = vmatpush1.msra.mxu0 %v1875_v12 }
 0x865   :  { %1077 = vmatprep.subr.mxu0 %v1878_v14 }
 0x866   :  { %1078 = vmatpush1.msra.mxu0 %v1881_v16 }
 0x867   :  { %1079 = vmatprep.subr.mxu0 %v1884_v18 }
 0x868   :  { %1080 = vmatpush1.msra.mxu0 %v1887_v19 }
 0x869   :  { %1081 = vmatprep.subr.mxu0 %v1890_v20 }
 0x86a   :  { %1082 = vmatpush1.msra.mxu0 %v1894_v21 }
 0x86b   :  { %1083 = vmatprep.subr.mxu0 %v1898_v23 }
 0x86c   :  { %1084 = vmatpush1.msra.mxu0 %v1901_v24 }
 0x86d   :  { %1085 = vmatprep.subr.mxu0 %v1905_v25 }
 0x86e   :  { %1086 = vmatpush1.msra.mxu0 %v1910_v26 }
 0x86f   :  { %1403 = vmatprep.subr.mxu0 %v1862_v2  ;;  %v668_v2 = vsel %vm667_vm15, %v648_v54, %v2099_v9 }
 0x870   :  { %v2168_v41 = vsel %vm84_vm0, %v671_v34, %v668_v2 }
 0x91f   :  { %v776_v29 = vpop.f32.mrf.mxu0 }
 0x920   :  { %v777_v30 = vadd.f32 %v776_v29, %v703_v17 }
 0x921   :  { %v778_v31 = vpop.f32.mrf.mxu0 }
 0x922   :  { %1628 = vtanh.f32 %v777_v30  ;;  %v779_v32 = vadd.f32 %v778_v31, %v704_v56  ;;  %v1551_v42 = vmul.f32 -1.442695, %v777_v30 }
 0x924   :  { %1630 = vtanh.f32 %v779_v32  ;;  %v1552_v43 = vmul.f32 -1.442695, %v779_v32 }
 0x925   :  { %1632 = vpow2.f32 %v1551_v42 }
 0x926   :  { %1634 = vpow2.f32 %v1552_v43 }
 0x92f   :  { %v1629_v33 = vpop.eup %1628 }
 0x930   :  { %801 = vrot.lane.b32.xlu0 %v1629_v33, %s1814_s12 }
 0x931   :  { %v1631_v35 = vpop.eup %1630 }
 0x932   :  { %818 = vrot.lane.b32.xlu1 %v1631_v35, %s1814_s12  ;;  %v1633_v44 = vpop.eup %1632 }
 0x933   :  { %v1635_v47 = vpop.eup %1634  ;;  %v787_v48 = vadd.f32 1.0, %v1633_v44 }
 0x934   :  { %796 = vrot.lane.b32.xlu0 %v2168_v41, %s1815_s4  ;;  %v788_v50 = vadd.f32 1.0, %v1635_v47 }
 0x935   :  { %1636 = vrcp.f32 %v787_v48 }
 0x936   :  { %1638 = vrcp.f32 %v788_v50 }
 0x942   :  { %v1637_v40 = vpop.eup %1636 }
 0x943   :  { %v1639_v53 = vpop.eup %1638 }
 0x944   :  { %v816_v7 = vmul.f32 %v1639_v53, %v2168_v41 }
 0x9a2   :  { %v802_v9 = vpop.permute.xlu0 %801 }
 0x9a3   :  { %v804_v52 = vmul.f32 %v1637_v40, %v802_v9 }
 0x9a4   :  { %v819_v54 = vpop.permute.xlu1 %818 }
 0x9a5   :  { %806 = vrot.lane.b32.xlu1 %v804_v52, %s1815_s4  ;;  %v821_v55 = vmul.f32 %v1639_v53, %v819_v54 }
 0x9a6   :  { %v797_v63 = vpop.permute.xlu0 %796 }
 0x9a7   :  { %823 = vrot.lane.b32.xlu0 %v821_v55, %s1815_s4  ;;  %v799_v1 = vmul.f32 %v1637_v40, %v797_v63 }
 0x9a9   :  { %837 = vperm.xlu1 %1579, %v835_v58  }
 0x9ab   :  { %843 = vperm.xlu0 %1578, %v841_v61  }
 0xa17   :  { %v807_v3 = vpop.permute.xlu1 %806 }
 0xa18   :  { %v809_v57 = vadd.f32 %v807_v3, %v799_v1 }
 0xa19   :  { %v824_v45 = vpop.permute.xlu0 %823 }
 0xa1a   :  { %1640 = vtanh.f32 %v809_v57  ;;  %v826_v11 = vadd.f32 %v824_v45, %v816_v7 }
 0xa1c   :  { %1642 = vtanh.f32 %v826_v11 }
 0xa24   :  { %v2185_v27 = vpop.permute.xlu1 %837 }
 0xa25   :  { %vm839_vm8 = vcmp.eq.s32.totalorder %v2185_v27, 1 }
 0xa26   :  { %v2187_v17 = vpop.permute.xlu0 %843  ;;  %v840_v35 = vsel %vm839_vm8, %v809_v57, %v797_v63 }
 0xa27   :  { %v1641_v13 = vpop.eup %1640  ;;  %vm845_vm9 = vcmp.eq.s32.totalorder %v2187_v17, 1 }
 0xa28   :  { %812 = vrot.lane.b32.xlu1 %v1641_v13, %s1814_s12 }
 0xa29   :  { %v1643_v49 = vpop.eup %1642 }
 0xa2a   :  { %829 = vrot.lane.b32.xlu0 %v1643_v49, %s1814_s12 }
 0xa2c   :  { %852 = vrot.lane.b32.xlu1 %v2138_v15, %s1816_s13 }
 0xa2e   :  { %856 = vrot.lane.b32.xlu0 %v2138_v15, %s1814_s12 }
 0xa9a   :  { %v813_v29 = vpop.permute.xlu1 %812 }
 0xa9b   :  { %v2189_v30 = vmul.f32 %v1637_v40, %v813_v29 }
 0xa9c   :  { %v830_v56 = vpop.permute.xlu0 %829 }
 0xa9d   :  { %v2195_v33 = vmul.f32 %v1639_v53, %v830_v56 }
 0xa9e   :  { %v853_v31 = vpop.permute.xlu1 %852 }
 0xa9f   :  { %v855_v32 = vsel %vm839_vm8, %v2189_v30, %v853_v31 }
 0xaa0   :  { %861 = vrot.lane.b32.xlu1 %v855_v32, %s1815_s4  ;;  %v857_v15 = vpop.permute.xlu0 %856 }
 0xaa1   :  { %v859_v34 = vsel %vm845_vm9, %v2195_v33, %v857_v15 }
 0xaa2   :  { %865 = vrot.lane.b32.xlu0 %v859_v34, %s1814_s12 }
 0xaa4   :  { %848 = vrot.lane.b32.xlu1 %v840_v35, %s1816_s13 }
 0xb12   :  { %v862_v2 = vpop.permute.xlu1 %861 }
 0xb14   :  { %v866_v42 = vpop.permute.xlu0 %865 }
 0xb15   :  { %v2207_v43 = vsel %vm84_vm0, %v862_v2, %v866_v42 }
 0xb16   :  { %1553 = vmatmul.mubr.msk.f32.vlgmr.msra.gmra.mxu1 %vm188_vm7, %v2207_v43 }
 0xb17   :  { %1238 = vmatpush1.msra.mxu1 %v1865_v4  ;;  %1285 = vmatprep.mubr.f32.mxu1 %v1812_v0 }
 0xb18   :  { %1239 = vmatprep.subr.mxu1 %v1867_v6 }
 0xb19   :  { %1240 = vmatpush1.msra.mxu1 %v1870_v8  ;;  %v882_v8 = vrot.slane %v1955_v37, 6 }
 0xb1a   :  { %1241 = vmatprep.subr.mxu1 %v1873_v10 }
 0xb1b   :  { %1242 = vmatpush1.msra.mxu1 %v1875_v12 }
 0xb1c   :  { %1243 = vmatprep.subr.mxu1 %v1878_v14 }
 0xb1d   :  { %1244 = vmatpush1.msra.mxu1 %v1881_v16  ;;  %v849_v16 = vpop.permute.xlu1 %848 }
 0xb1e   :  { %1245 = vmatprep.subr.mxu1 %v1884_v18 }
 0xb1f   :  { %1246 = vmatpush1.msra.mxu1 %v1887_v19  ;;  %v846_v19 = vsel %vm845_vm9, %v826_v11, %v2168_v41 }
 0xb20   :  { %1247 = vmatprep.subr.mxu1 %v1890_v20  ;;  %v2237_v20 = vsel %vm84_vm0, %v849_v16, %v846_v19  ;;  %v1713_v16 = vld [vmem:[#allocation7 + $0x48] sm:$0xff]  ;;  %v1715_v19 = vld [vmem:[#allocation7 + $0x38] sm:$0xff] }
 0xb21   :  { %1248 = vmatpush1.msra.mxu1 %v1894_v21 }
 0xb22   :  { %1249 = vmatprep.subr.mxu1 %v1898_v23 }
 0xb23   :  { %1250 = vmatpush1.msra.mxu1 %v1901_v24 }
 0xb24   :  { %1251 = vmatprep.subr.mxu1 %v1905_v25 }
 0xb25   :  { %1252 = vmatpush1.msra.mxu1 %v1910_v26 }
 0xbd6   :  { %v953_v4 = vpop.f32.mrf.mxu1 }
 0xbd7   :  { %v954_v6 = vadd.f32 %v953_v4, %v1957_v39  ;;  %v1708_v4 = vld [vmem:[#allocation7 + $0x70] sm:$0xff] }
 0xbd8   :  { %v955_v10 = vpop.f32.mrf.mxu1 }
 0xbd9   :  { %1644 = vtanh.f32 %v954_v6  ;;  %v956_v12 = vadd.f32 %v955_v10, %v882_v8  ;;  %v1554_v21 = vmul.f32 -1.442695, %v954_v6  ;;  %v1709_v6 = vld [vmem:[#allocation7 + $0x68] sm:$0xff]  ;;  %v1710_v10 = vld [vmem:[#allocation7 + $0x60] sm:$0xff] }
 0xbdb   :  { %1646 = vtanh.f32 %v956_v12  ;;  %v1555_v44 = vmul.f32 -1.442695, %v956_v12  ;;  %v1711_v12 = vld [vmem:[#allocation7 + $0x58] sm:$0xff] }
 0xbdc   :  { %1648 = vpow2.f32 %v1554_v21  ;;  %v1716_v21 = vld [vmem:[#allocation7 + $0x30] sm:$0xff] }
 0xbdd   :  { %1650 = vpow2.f32 %v1555_v44  ;;  %v1717_v44 = vld [vmem:[#allocation7 + $0x28] sm:$0xff] }
 0xbe6   :  { %v1645_v14 = vpop.eup %1644 }
 0xbe7   :  { %978 = vrot.lane.b32.xlu0 %v1645_v14, %s1814_s12  ;;  %v1712_v14 = vld [vmem:[#allocation7 + $0x50] sm:$0xff] }
 0xbe8   :  { %v1647_v18 = vpop.eup %1646 }
 0xbe9   :  { %995 = vrot.lane.b32.xlu1 %v1647_v18, %s1814_s12  ;;  %v1649_v47 = vpop.eup %1648  ;;  %v1714_v18 = vld [vmem:[#allocation7 + $0x40] sm:$0xff] }
 0xbea   :  { %v1651_v48 = vpop.eup %1650  ;;  %v964_v50 = vadd.f32 1.0, %v1649_v47  ;;  %v1718_v47 = vld [vmem:[#allocation7 + $0x20] sm:$0xff] }
 0xbeb   :  { %973 = vrot.lane.b32.xlu0 %v2237_v20, %s1815_s4  ;;  %v965_v40 = vadd.f32 1.0, %v1651_v48  ;;  %v1048_v48 = vrot.slane %v1957_v39, 2 }
 0xbec   :  { %1652 = vrcp.f32 %v964_v50 }
 0xbed   :  { %1654 = vrcp.f32 %v965_v40 }
 0xbf9   :  { %v1653_v9 = vpop.eup %1652 }
 0xbfa   :  { %v1655_v53 = vpop.eup %1654 }
 0xbfb   :  { %v993_v3 = vmul.f32 %v1655_v53, %v2237_v20 }
 0xc59   :  { %v979_v41 = vpop.permute.xlu0 %978 }
 0xc5a   :  { %v981_v52 = vmul.f32 %v1653_v9, %v979_v41 }
 0xc5b   :  { %v996_v54 = vpop.permute.xlu1 %995 }
 0xc5c   :  { %983 = vrot.lane.b32.xlu1 %v981_v52, %s1815_s4  ;;  %v998_v55 = vmul.f32 %v1655_v53, %v996_v54 }
 0xc5d   :  { %v974_v58 = vpop.permute.xlu0 %973 }
 0xc5e   :  { %1000 = vrot.lane.b32.xlu0 %v998_v55, %s1815_s4  ;;  %v976_v61 = vmul.f32 %v1653_v9, %v974_v58 }
 0xcce   :  { %v984_v63 = vpop.permute.xlu1 %983 }
 0xccf   :  { %v986_v1 = vadd.f32 %v984_v63, %v976_v61 }
 0xcd0   :  { %v1001_v57 = vpop.permute.xlu0 %1000 }
 0xcd1   :  { %1656 = vtanh.f32 %v986_v1  ;;  %v2244_v7 = vadd.f32 %v1001_v57, %v993_v3  ;;  %v1010_v35 = vsel %vm845_vm9, %v986_v1, %v974_v58 }
 0xcd3   :  { %1658 = vtanh.f32 %v2244_v7 }
 0xcde   :  { %v1657_v45 = vpop.eup %1656 }
 0xcdf   :  { %989 = vrot.lane.b32.xlu1 %v1657_v45, %s1814_s12 }
 0xce0   :  { %v1659_v11 = vpop.eup %1658 }
 0xce1   :  { %1006 = vrot.lane.b32.xlu0 %v1659_v11, %s1814_s12 }
 0xce3   :  { %1017 = vrot.lane.b32.xlu1 %v2207_v43, %s1816_s13 }
 0xce5   :  { %1021 = vrot.lane.b32.xlu0 %v2207_v43, %s1814_s12 }
 0xd51   :  { %v990_v13 = vpop.permute.xlu1 %989 }
 0xd52   :  { %v2253_v49 = vmul.f32 %v1653_v9, %v990_v13 }
 0xd53   :  { %v1007_v29 = vpop.permute.xlu0 %1006 }
 0xd54   :  { %v2258_v32 = vmul.f32 %v1655_v53, %v1007_v29 }
 0xd55   :  { %v1018_v56 = vpop.permute.xlu1 %1017 }
 0xd56   :  { %v1020_v31 = vsel %vm845_vm9, %v2253_v49, %v1018_v56 }
 0xd57   :  { %1026 = vrot.lane.b32.xlu1 %v1020_v31, %s1815_s4  ;;  %v1022_v15 = vpop.permute.xlu0 %1021 }
 0xd58   :  { %v1024_v34 = vsel %vm839_vm8, %v2258_v32, %v1022_v15 }
 0xd59   :  { %1030 = vrot.lane.b32.xlu0 %v1024_v34, %s1814_s12 }
 0xd5b   :  { %1013 = vrot.lane.b32.xlu1 %v1010_v35, %s1816_s13 }
 0xdc9   :  { %v1027_v2 = vpop.permute.xlu1 %1026 }
 0xdcb   :  { %v1031_v42 = vpop.permute.xlu0 %1030 }
 0xdcc   :  { %v2269_v43 = vsel %vm84_vm0, %v1027_v2, %v1031_v42 }
 0xdcd   :  { %1556 = vmatmul.mubr.msk.f32.vlgmr.msra.gmra.mxu0 %vm188_vm7, %v2269_v43  ;;  %v1014_v53 = vpop.permute.xlu1 %1013 }
 0xdce   :  { %1404 = vmatpush1.msra.mxu0 %v1708_v4  ;;  %1451 = vmatprep.mubr.f32.mxu0 %v1812_v0  ;;  %v1046_v0 = vrot.slane %v1955_v37, 2 }
 0xdcf   :  { %1405 = vmatprep.subr.mxu0 %v1709_v6 }
 0xdd0   :  { %1406 = vmatpush1.msra.mxu0 %v1710_v10  ;;  %v1049_v9 = vrot.slane %v1046_v0, 2 }
 0xdd1   :  { %1407 = vmatprep.subr.mxu0 %v1711_v12 }
 0xdd2   :  { %1408 = vmatpush1.msra.mxu0 %v1712_v14 }
 0xdd3   :  { %1409 = vmatprep.subr.mxu0 %v1713_v16 }
 0xdd4   :  { %1410 = vmatpush1.msra.mxu0 %v1714_v18 }
 0xdd5   :  { %1411 = vmatprep.subr.mxu0 %v1715_v19 }
 0xdd6   :  { %1412 = vmatpush1.msra.mxu0 %v1716_v21 }
 0xdd7   :  { %1413 = vmatprep.subr.mxu0 %v1717_v44 }
 0xdd8   :  { %1414 = vmatpush1.msra.mxu0 %v1718_v47 }
 0xdd9   :  { %1415 = vmatprep.subr.mxu0 %v1898_v23 }
 0xdda   :  { %1416 = vmatpush1.msra.mxu0 %v1901_v24 }
 0xddb   :  { %1417 = vmatprep.subr.mxu0 %v1905_v25  ;;  %v1011_v25 = vsel %vm839_vm8, %v2244_v7, %v2237_v20 }
 0xddc   :  { %1418 = vmatpush1.msra.mxu0 %v1910_v26  ;;  %v2289_v26 = vsel %vm84_vm0, %v1014_v53, %v1011_v25 }
 0xe8d   :  { %v1121_v50 = vpop.f32.mrf.mxu0 }
 0xe8e   :  { %v1122_v40 = vadd.f32 %v1121_v50, %v1048_v48  ;;  %v1214_v48 = vrot.slane %v1957_v39, 4 }
 0xe8f   :  { %v1123_v41 = vpop.f32.mrf.mxu0 }
 0xe90   :  { %1660 = vtanh.f32 %v1122_v40  ;;  %v1124_v52 = vadd.f32 %v1123_v41, %v1049_v9  ;;  %v1557_v54 = vmul.f32 -1.442695, %v1122_v40  ;;  %v1215_v9 = vrot.slane %v882_v8, 4 }
 0xe92   :  { %1662 = vtanh.f32 %v1124_v52  ;;  %v1558_v55 = vmul.f32 -1.442695, %v1124_v52 }
 0xe93   :  { %1664 = vpow2.f32 %v1557_v54 }
 0xe94   :  { %1666 = vpow2.f32 %v1558_v55 }
 0xe9d   :  { %v1661_v23 = vpop.eup %1660 }
 0xe9e   :  { %1146 = vrot.lane.b32.xlu0 %v1661_v23, %s1814_s12 }
 0xe9f   :  { %v1663_v24 = vpop.eup %1662 }
 0xea0   :  { %1163 = vrot.lane.b32.xlu1 %v1663_v24, %s1814_s12  ;;  %v1665_v58 = vpop.eup %1664 }
 0xea1   :  { %v1667_v61 = vpop.eup %1666  ;;  %v1132_v63 = vadd.f32 1.0, %v1665_v58 }
 0xea2   :  { %1141 = vrot.lane.b32.xlu0 %v2289_v26, %s1815_s4  ;;  %v1133_v1 = vadd.f32 1.0, %v1667_v61 }
 0xea3   :  { %1668 = vrcp.f32 %v1132_v63 }
 0xea4   :  { %1670 = vrcp.f32 %v1133_v1 }
 0xeb0   :  { %v1669_v3 = vpop.eup %1668 }
 0xeb1   :  { %v1671_v7 = vpop.eup %1670 }
 0xeb2   :  { %v1161_v15 = vmul.f32 %v1671_v7, %v2289_v26 }
 0xf10   :  { %v1147_v20 = vpop.permute.xlu0 %1146 }
 0xf11   :  { %v1149_v57 = vmul.f32 %v1669_v3, %v1147_v20 }
 0xf12   :  { %v1164_v45 = vpop.permute.xlu1 %1163 }
 0xf13   :  { %1151 = vrot.lane.b32.xlu1 %v1149_v57, %s1815_s4  ;;  %v1166_v11 = vmul.f32 %v1671_v7, %v1164_v45 }
 0xf14   :  { %v1142_v13 = vpop.permute.xlu0 %1141 }
 0xf15   :  { %1168 = vrot.lane.b32.xlu0 %v1166_v11, %s1815_s4  ;;  %v1144_v29 = vmul.f32 %v1669_v3, %v1142_v13 }
 0xf85   :  { %v1152_v56 = vpop.permute.xlu1 %1151 }
 0xf86   :  { %v1154_v31 = vadd.f32 %v1152_v56, %v1144_v29 }
 0xf87   :  { %v1169_v34 = vpop.permute.xlu0 %1168 }
 0xf88   :  { %1672 = vtanh.f32 %v1154_v31  ;;  %v1171_v35 = vadd.f32 %v1169_v34, %v1161_v15 }
 0xf8a   :  { %1674 = vtanh.f32 %v1171_v35  ;;  %v1179_v25 = vsel %vm661_vm14, %v1171_v35, %v2289_v26 }
 0xf95   :  { %v1673_v2 = vpop.eup %1672 }
 0xf96   :  { %1157 = vrot.lane.b32.xlu1 %v1673_v2, %s1814_s12 }
 0xf97   :  { %v1675_v42 = vpop.eup %1674 }
 0xf98   :  { %1174 = vrot.lane.b32.xlu0 %v1675_v42, %s1814_s12 }
 0xf9a   :  { %1185 = vrot.lane.b32.xlu1 %v2269_v43, %s1816_s13 }
 0xf9c   :  { %1189 = vrot.lane.b32.xlu0 %v2269_v43, %s1814_s12  ;;  %v1178_v43 = vsel %vm667_vm15, %v1154_v31, %v1142_v13 }
0x1008   :  { %v1158_v4 = vpop.permute.xlu1 %1157 }
0x1009   :  { %v2302_v6 = vmul.f32 %v1669_v3, %v1158_v4 }
0x100a   :  { %v1175_v10 = vpop.permute.xlu0 %1174 }
0x100b   :  { %v2307_v16 = vmul.f32 %v1671_v7, %v1175_v10 }
0x100c   :  { %v1186_v12 = vpop.permute.xlu1 %1185 }
0x100d   :  { %v1188_v14 = vsel %vm667_vm15, %v2302_v6, %v1186_v12  ;;  %v1208_v17 = vsel %vm661_vm14, %v2307_v16, 0.0 }
0x100e   :  { %1194 = vrot.lane.b32.xlu1 %v1188_v14, %s1815_s4  ;;  %v1190_v18 = vpop.permute.xlu0 %1189 }
0x100f   :  { %v1192_v19 = vsel %vm661_vm14, %v2307_v16, %v1190_v18 }
0x1010   :  { %1198 = vrot.lane.b32.xlu0 %v1192_v19, %s1814_s12 }
0x1012   :  { %1181 = vrot.lane.b32.xlu1 %v1178_v43, %s1816_s13 }
0x1080   :  { %v1195_v21 = vpop.permute.xlu1 %1194 }
0x1082   :  { %v1199_v44 = vpop.permute.xlu0 %1198 }
0x1083   :  { %v1201_v47 = vsel %vm84_vm0, %v1195_v21, %v1199_v44 }
0x1084   :  { %1559 = vmatmul.mubr.msk.f32.vlgmr.msra.gmra.mxu1 %vm188_vm7, %v1201_v47  ;;  %v1182_v53 = vpop.permute.xlu1 %1181 }
0x1085   :  { %v2328_v54 = vsel %vm84_vm0, %v1182_v53, %v1179_v25 }
0x1144   :  { %v1287_v50 = vpop.f32.mrf.mxu1 }
0x1145   :  { %v1288_v40 = vadd.f32 %v1287_v50, %v1214_v48  ;;  %v1380_v50 = vrot.slane %v1957_v39, 6 }
0x1146   :  { %v1289_v41 = vpop.f32.mrf.mxu1 }
0x1147   :  { %1676 = vtanh.f32 %v1288_v40  ;;  %v1290_v52 = vadd.f32 %v1289_v41, %v1215_v9  ;;  %v1560_v8 = vmul.f32 -1.442695, %v1288_v40  ;;  %v1381_v41 = vrot.slane %v1046_v0, 6 }
0x1149   :  { %1678 = vtanh.f32 %v1290_v52  ;;  %v1561_v55 = vmul.f32 -1.442695, %v1290_v52 }
0x114a   :  { %1680 = vpow2.f32 %v1560_v8 }
0x114b   :  { %1682 = vpow2.f32 %v1561_v55 }
0x1154   :  { %v1677_v23 = vpop.eup %1676 }
0x1155   :  { %1312 = vrot.lane.b32.xlu0 %v1677_v23, %s1814_s12 }
0x1156   :  { %v1679_v24 = vpop.eup %1678 }
0x1157   :  { %1329 = vrot.lane.b32.xlu1 %v1679_v24, %s1814_s12  ;;  %v1681_v58 = vpop.eup %1680 }
0x1158   :  { %v1683_v61 = vpop.eup %1682  ;;  %v1298_v63 = vadd.f32 1.0, %v1681_v58 }
0x1159   :  { %1307 = vrot.lane.b32.xlu0 %v2328_v54, %s1815_s4  ;;  %v1299_v1 = vadd.f32 1.0, %v1683_v61 }
0x115a   :  { %1684 = vrcp.f32 %v1298_v63 }
0x115b   :  { %1686 = vrcp.f32 %v1299_v1 }
0x1167   :  { %v1685_v3 = vpop.eup %1684 }
0x1168   :  { %v1687_v57 = vpop.eup %1686 }
0x1169   :  { %v1327_v31 = vmul.f32 %v1687_v57, %v2328_v54 }
0x11c7   :  { %v1313_v26 = vpop.permute.xlu0 %1312 }
0x11c8   :  { %v1315_v20 = vmul.f32 %v1685_v3, %v1313_v26 }
0x11c9   :  { %v1330_v7 = vpop.permute.xlu1 %1329 }
0x11ca   :  { %1317 = vrot.lane.b32.xlu1 %v1315_v20, %s1815_s4  ;;  %v1332_v45 = vmul.f32 %v1687_v57, %v1330_v7 }
0x11cb   :  { %v1308_v11 = vpop.permute.xlu0 %1307 }
0x11cc   :  { %1334 = vrot.lane.b32.xlu0 %v1332_v45, %s1815_s4  ;;  %v1310_v13 = vmul.f32 %v1685_v3, %v1308_v11 }
0x123c   :  { %v1318_v29 = vpop.permute.xlu1 %1317 }
0x123d   :  { %v1320_v56 = vadd.f32 %v1318_v29, %v1310_v13 }
0x123e   :  { %v1335_v15 = vpop.permute.xlu0 %1334 }
0x123f   :  { %1688 = vtanh.f32 %v1320_v56  ;;  %v1337_v34 = vadd.f32 %v1335_v15, %v1327_v31  ;;  %v1344_v21 = vsel %vm489_vm11, %v1320_v56, %v1308_v11 }
0x1241   :  { %1690 = vtanh.f32 %v1337_v34  ;;  %v1345_v8 = vsel %vm483_vm10, %v1337_v34, %v2328_v54 }
0x124c   :  { %v1689_v35 = vpop.eup %1688 }
0x124d   :  { %1323 = vrot.lane.b32.xlu1 %v1689_v35, %s1814_s12  ;;  %v513_v35 = vsel %vm483_vm10, %v2051_v46, 0.0  ;;  %v869_v46 = vsel %vm839_vm8, %v2189_v30, 0.0  ;;  %v1202_v30 = vsel %vm667_vm15, %v2302_v6, 0.0 }
0x124e   :  { %v1691_v2 = vpop.eup %1690 }
0x124f   :  { %1340 = vrot.lane.b32.xlu0 %v1691_v2, %s1814_s12  ;;  %v519_v2 = vsel %vm489_vm11, %v2057_v51, 0.0  ;;  %v875_v51 = vsel %vm845_vm9, %v2195_v33, 0.0 }
0x1251   :  { %1351 = vrot.lane.b32.xlu1 %v1201_v47, %s1816_s13 }
0x1253   :  { %1355 = vrot.lane.b32.xlu0 %v1201_v47, %s1814_s12 }
0x12bf   :  { %v1324_v42 = vpop.permute.xlu1 %1323 }
0x12c0   :  { %v2339_v4 = vmul.f32 %v1685_v3, %v1324_v42  ;;  %v691_v42 = vsel %vm661_vm14, %v2120_v62, 0.0  ;;  %v1034_v62 = vsel %vm845_vm9, %v2253_v49, 0.0 }
0x12c1   :  { %v1341_v10 = vpop.permute.xlu0 %1340 }
0x12c2   :  { %v2344_v18 = vmul.f32 %v1687_v57, %v1341_v10  ;;  %v697_v10 = vsel %vm667_vm15, %v2126_v5, 0.0  ;;  %v1040_v5 = vsel %vm839_vm8, %v2258_v32, 0.0  ;;  %v1368_v33 = vsel %vm489_vm11, %v2339_v4, 0.0 }
0x12c3   :  { %v1352_v12 = vpop.permute.xlu1 %1351 }
0x12c4   :  { %v1354_v14 = vsel %vm489_vm11, %v2339_v4, %v1352_v12  ;;  %v1374_v60 = vsel %vm483_vm10, %v2344_v18, 0.0 }
0x12c5   :  { %1360 = vrot.lane.b32.xlu1 %v1354_v14, %s1815_s4  ;;  %v1356_v19 = vpop.permute.xlu0 %1355 }
0x12c6   :  { %v1358_v43 = vsel %vm483_vm10, %v2344_v18, %v1356_v19 }
0x12c7   :  { %1364 = vrot.lane.b32.xlu0 %v1358_v43, %s1814_s12 }
0x12c9   :  { %1347 = vrot.lane.b32.xlu1 %v1344_v21, %s1816_s13 }
0x1337   :  { %v1361_v44 = vpop.permute.xlu1 %1360 }
0x1339   :  { %v1365_v47 = vpop.permute.xlu0 %1364 }
0x133a   :  { %v1367_v48 = vsel %vm84_vm0, %v1361_v44, %v1365_v47 }
0x133b   :  { %1562 = vmatmul.mubr.msk.f32.vlgmr.msra.gmra.mxu0 %vm188_vm7, %v1367_v48  ;;  %v1348_v24 = vpop.permute.xlu1 %1347 }
0x133c   :  { %v1350_v39 = vsel %vm84_vm0, %v1348_v24, %v1345_v8 }
0x13fb   :  { %v1453_v40 = vpop.f32.mrf.mxu0 }
0x13fc   :  { %v1454_v9 = vadd.f32 %v1453_v40, %v1380_v50 }
0x13fd   :  { %v1455_v52 = vpop.f32.mrf.mxu0 }
0x13fe   :  { %1692 = vtanh.f32 %v1454_v9  ;;  %v1456_v23 = vadd.f32 %v1455_v52, %v1381_v41  ;;  %v1563_v37 = vmul.f32 -1.442695, %v1454_v9 }
0x1400   :  { %1694 = vtanh.f32 %v1456_v23  ;;  %v1564_v0 = vmul.f32 -1.442695, %v1456_v23 }
0x1401   :  { %1696 = vpow2.f32 %v1563_v37 }
0x1402   :  { %1698 = vpow2.f32 %v1564_v0 }
0x140b   :  { %v1693_v53 = vpop.eup %1692 }
0x140c   :  { %1478 = vrot.lane.b32.xlu0 %v1693_v53, %s1814_s12 }
0x140d   :  { %v1695_v25 = vpop.eup %1694 }
0x140e   :  { %1495 = vrot.lane.b32.xlu1 %v1695_v25, %s1814_s12  ;;  %v1697_v55 = vpop.eup %1696 }
0x140f   :  { %v1699_v58 = vpop.eup %1698  ;;  %v1464_v61 = vadd.f32 1.0, %v1697_v55 }
0x1410   :  { %1473 = vrot.lane.b32.xlu0 %v1350_v39, %s1815_s4  ;;  %v1465_v63 = vadd.f32 1.0, %v1699_v58 }
0x1411   :  { %1700 = vrcp.f32 %v1464_v61 }
0x1412   :  { %1702 = vrcp.f32 %v1465_v63 }
0x141e   :  { %v1701_v1 = vpop.eup %1700 }
0x141f   :  { %v1703_v54 = vpop.eup %1702 }
0x1420   :  { %v1493_v29 = vmul.f32 %v1703_v54, %v1350_v39 }
0x147e   :  { %v1479_v3 = vpop.permute.xlu0 %1478 }
0x147f   :  { %v1481_v26 = vmul.f32 %v1701_v1, %v1479_v3 }
0x1480   :  { %v1496_v20 = vpop.permute.xlu1 %1495 }
0x1481   :  { %1483 = vrot.lane.b32.xlu1 %v1481_v26, %s1815_s4  ;;  %v1498_v57 = vmul.f32 %v1703_v54, %v1496_v20 }
0x1482   :  { %v1474_v7 = vpop.permute.xlu0 %1473 }
0x1483   :  { %1500 = vrot.lane.b32.xlu0 %v1498_v57, %s1815_s4  ;;  %v1476_v45 = vmul.f32 %v1701_v1, %v1474_v7 }
0x14f3   :  { %v1484_v11 = vpop.permute.xlu1 %1483 }
0x14f4   :  { %v1486_v13 = vadd.f32 %v1484_v11, %v1476_v45 }
0x14f5   :  { %v1501_v56 = vpop.permute.xlu0 %1500 }
0x14f6   :  { %1704 = vtanh.f32 %v1486_v13  ;;  %v1503_v31 = vadd.f32 %v1501_v56, %v1493_v29 }
0x14f8   :  { %1706 = vtanh.f32 %v1503_v31 }
0x1503   :  { %v1705_v15 = vpop.eup %1704 }
0x1504   :  { %1489 = vrot.lane.b32.xlu1 %v1705_v15, %s1814_s12 }
0x1505   :  { %v1707_v34 = vpop.eup %1706 }
0x1506   :  { %1506 = vrot.lane.b32.xlu0 %v1707_v34, %s1814_s12 }
0x1508   :  { %515 = vrot.lane.b32.xlu1 %v513_v35, %s1815_s4 }
0x150a   :  { %521 = vrot.lane.b32.xlu0 %v519_v2, %s1814_s12 }
0x150c   :  { %693 = vrot.lane.b32.xlu1 %v691_v42, %s1815_s4 }
0x150e   :  { %699 = vrot.lane.b32.xlu0 %v697_v10, %s1814_s12 }
0x1510   :  { %871 = vrot.lane.b32.xlu1 %v869_v46, %s1815_s4 }
0x1512   :  { %877 = vrot.lane.b32.xlu0 %v875_v51, %s1814_s12 }
0x1514   :  { %1036 = vrot.lane.b32.xlu1 %v1034_v62, %s1815_s4 }
0x1516   :  { %1042 = vrot.lane.b32.xlu0 %v1040_v5, %s1814_s12 }
0x1518   :  { %1204 = vrot.lane.b32.xlu1 %v1202_v30, %s1815_s4 }
0x151a   :  { %1210 = vrot.lane.b32.xlu0 %v1208_v17, %s1814_s12 }
0x151c   :  { %1370 = vrot.lane.b32.xlu1 %v1368_v33, %s1815_s4 }
0x151e   :  { %1376 = vrot.lane.b32.xlu0 %v1374_v60, %s1814_s12 }
0x1576   :  { %v1490_v27 = vpop.permute.xlu1 %1489 }
0x1577   :  { %v1492_v49 = vmul.f32 %v1701_v1, %v1490_v27 }
0x1578   :  { %v1507_v32 = vpop.permute.xlu0 %1506 }
0x1579   :  { %v1510_v59 = vsel %vm323_vm4, %v1492_v49, 0.0  ;;  %v1509_v6 = vmul.f32 %v1703_v54, %v1507_v32 }
0x157a   :  { %1512 = vrot.lane.b32.xlu1 %v1510_v59, %s1815_s4  ;;  %v516_v38 = vpop.permute.xlu1 %515 }
0x157b   :  { %518 = vst.msk [vmem:[#allocation8 + $0x2] sm:$0x3] %vm341_vm5, %v516_v38  ;;  %v1516_v16 = vsel %vm317_vm3, %v1509_v6, 0.0 }
0x157c   :  { %1518 = vrot.lane.b32.xlu0 %v1516_v16, %s1814_s12  ;;  %v522_v36 = vpop.permute.xlu0 %521 }
0x157d   :  { %524 = vst.msk [vmem:[#allocation8 + $0xc] sm:$0x3] %vm343_vm6, %v522_v36 }
0x157e   :  { %v694_v4 = vpop.permute.xlu1 %693 }
0x157f   :  { %696 = vst.msk [vmem:[#allocation8 + $0x4] sm:$0x3] %vm341_vm5, %v694_v4 }
0x1580   :  { %v700_v22 = vpop.permute.xlu0 %699 }
0x1581   :  { %702 = vst.msk [vmem:[#allocation8 + $0xa] sm:$0x3] %vm343_vm6, %v700_v22 }
0x1582   :  { %v872_v12 = vpop.permute.xlu1 %871 }
0x1583   :  { %874 = vst.msk [vmem:[#allocation8 + $0x6] sm:$0x3] %vm341_vm5, %v872_v12 }
0x1584   :  { %v878_v14 = vpop.permute.xlu0 %877 }
0x1585   :  { %880 = vst.msk [vmem:[#allocation8 + $0x8] sm:$0x3] %vm343_vm6, %v878_v14 }
0x1586   :  { %v1037_v18 = vpop.permute.xlu1 %1036 }
0x1587   :  { %1039 = vst.msk [vmem:[#allocation8 + $0x8] sm:$0x3] %vm341_vm5, %v1037_v18 }
0x1588   :  { %v1043_v28 = vpop.permute.xlu0 %1042 }
0x1589   :  { %1045 = vst.msk [vmem:[#allocation8 + $0x6] sm:$0x3] %vm343_vm6, %v1043_v28 }
0x158a   :  { %v1205_v19 = vpop.permute.xlu1 %1204 }
0x158b   :  { %1207 = vst.msk [vmem:[#allocation8 + $0xa] sm:$0x3] %vm341_vm5, %v1205_v19 }
0x158c   :  { %v1211_v43 = vpop.permute.xlu0 %1210 }
0x158d   :  { %1213 = vst.msk [vmem:[#allocation8 + $0x4] sm:$0x3] %vm343_vm6, %v1211_v43 }
0x158e   :  { %v1371_v21 = vpop.permute.xlu1 %1370 }
0x158f   :  { %1373 = vst.msk [vmem:[#allocation8 + $0xc] sm:$0x3] %vm341_vm5, %v1371_v21 }
0x1590   :  { %v1377_v44 = vpop.permute.xlu0 %1376 }
0x1591   :  { %1379 = vst.msk [vmem:[#allocation8 + $0x2] sm:$0x3] %vm343_vm6, %v1377_v44 }
0x15ec   :  { %v1513_v47 = vpop.permute.xlu1 %1512 }
0x15ed   :  { %1515 = vst.msk [vmem:[#allocation8 + $0xe] sm:$0x3] %vm341_vm5, %v1513_v47 }
0x15ee   :  { %v1519_v48 = vpop.permute.xlu0 %1518 }
0x15ef   :  { %1521 = vst.msk [vmem:[#allocation8] sm:$0x3] %vm343_vm6, %v1519_v48 }
0x15f0   :  { %1790 = shalt.err (!%p1787_p5)
}
0x15f1   :  { %1533 = dma.vmem_to_hbm [thread:$0]  %s1528_s15, 256, %s2449_s5, [#allocation4], %s1809_s28, %s1809_s28, %s1810_s29  }
0x15f2   :  { %1803 = dma.done.wait [#allocation4], 256  }
0x15f3   :  { %1804 = vsyncadd [#allocation4], 4294967040 }
0x15f4   :  { %1537 = vsyncpa [#allocation3], 1 }
0x15f5   :  { %1538 = vsyncpa [#allocation6], 1 }
0x15f6   :  { %1539 = vsyncpa [#allocation4], 1 }

</bundles_post_ra>
